<compile_context>
chip_gen: v7x
topology: tpu7x:2x2x1
jax: 0.10.0
libtpu: 0.0.40
codegen_flags: <defaults>
</compile_context>

<pallas_src>
import jax
import jax.numpy as jnp
from jax.experimental import pallas as pl
from jax.experimental.pallas import tpu as pltpu


NEG_INF = -1000000000.0   # matches masked_fill(mask, -1e9) in the reference


# ------------------------------------------------------------------ kernel ---

def _make_decoder_layer_kernel(B, S, Se, Sq, D, Dh, mxu_dtype, approx_recip,
                               lane_dense_out):
    """One DecoderLayer forward over a (B, Sq, D) query tile (Sq == S -> whole seq)."""

    full_q = (Sq == S)   # static: no query tiling -> fully fused QKV matmul

    def mm(a, w):
        # MXU matmul: operands cast to mxu_dtype (bf16 fast path), f32 accumulate.
        return jnp.dot(a.astype(w.dtype), w, preferred_element_type=jnp.float32)

    def layernorm(v, g_ref, b_ref, idx):
        g = g_ref[idx:idx + 1, :]                       # (1, D)
        b = b_ref[idx:idx + 1, :]                       # (1, D)
        mu = jnp.mean(v, axis=-1, keepdims=True)
        var = jnp.mean((v - mu) ** 2, axis=-1, keepdims=True)
        # rsqrt -> EUP slot instead of a VALU sqrt+divide chain.
        return (v - mu) * jax.lax.rsqrt(var + 1e-5) * g + b

    def softmax(s):
        m = jnp.max(s, axis=-1, keepdims=True)
        e = jnp.exp(s - m)
        denom = jnp.sum(e, axis=-1, keepdims=True)
        # approx reciprocal (EUP) when the accuracy budget allows (bf16 path).
        return e * pl.reciprocal(denom, approx=approx_recip)

    def attn_core(nq, nk, nv, causal, q_off):
        nq_rows = nq.shape[1]
        skv = nk.shape[1]
        s = jnp.einsum("bqd,bkd->bqk",
                       nq.astype(mxu_dtype), nk.astype(mxu_dtype),
                       preferred_element_type=jnp.float32)   # (B, Sq, Skv) f32
        if causal:
            # seq_mask(S) == tril(ones): masked_fill where col <= row.
            # Single 2-D mask broadcast over batch (no per-batch int32 iotas).
            row = jax.lax.broadcasted_iota(jnp.int32, (nq_rows, skv), 0) + q_off
            col = jax.lax.broadcasted_iota(jnp.int32, (nq_rows, skv), 1)
            s = jnp.where((col <= row)[None, :, :], NEG_INF, s)
        p = softmax(s)
        # TODO(synk): for very long S, online-softmax (flash-style) tiling over
        # the key axis instead of materializing the full (B, Sq, Skv) slab.
        return jnp.einsum("bqk,bkd->bqd",
                          p.astype(mxu_dtype), nv.astype(mxu_dtype),
                          preferred_element_type=jnp.float32)  # (B, Sq, Dh)

    def kernel(tgt_ref, enc_ref, pe_ref,
               wqkv_s_ref, bqkv_s_ref, wo_s_ref,
               wq_c_ref, bq_c_ref, wkv_c_ref, bkv_c_ref, wo_c_ref,
               ln_g_ref, ln_b_ref, ff_w1_ref, ff_w2_ref,
               out_ref):
        # Position encoding in-kernel, batch folded into the matmul M-dim.
        x = tgt_ref[...] + pe_ref[...]               # (B, S, D) f32
        x2 = x.reshape(B * S, D)
        enc2 = enc_ref[...].reshape(B * Se, D)

        # ---- masked self-attention -------------------------------------
        if full_q:
            q_off = 0
            x_q2 = x2
            # One fused (D, 3Dh) MXU push for Q|K|V (scale folded into Wq/bq).
            qkv = (mm(x2, wqkv_s_ref[...]) + bqkv_s_ref[...]).reshape(B, S, 3 * Dh)
            nq = qkv[:, :, 0:Dh]
            nk = qkv[:, :, Dh:2 * Dh]
            nv = qkv[:, :, 2 * Dh:3 * Dh]
        else:
            # Query-tiled path (v7x, 2 TensorCores): Q on the tile, fused K|V
            # on the full sequence.
            q_off = pl.multiple_of(pl.program_id(0) * Sq, Sq)
            x_q = tgt_ref[:, pl.ds(q_off, Sq), :] + pe_ref[pl.ds(q_off, Sq), :]
            x_q2 = x_q.reshape(B * Sq, D)
            nq = (mm(x_q2, wqkv_s_ref[:, 0:Dh])
                  + bqkv_s_ref[:, 0:Dh]).reshape(B, Sq, Dh)
            kv = (mm(x2, wqkv_s_ref[:, Dh:3 * Dh])
                  + bqkv_s_ref[:, Dh:3 * Dh]).reshape(B, S, 2 * Dh)
            nk = kv[:, :, 0:Dh]
            nv = kv[:, :, Dh:2 * Dh]

        head = attn_core(nq, nk, nv, causal=True, q_off=q_off)
        self_out = mm(head.reshape(B * Sq, Dh), wo_s_ref[...])      # (B*Sq, D)
        first = layernorm(self_out + x_q2, ln_g_ref, ln_b_ref, 0)

        # ---- cross attention (no mask) ----------------------------------
        nq_c = (mm(first, wq_c_ref[...]) + bq_c_ref[...]).reshape(B, Sq, Dh)
        kv_c = (mm(enc2, wkv_c_ref[...]) + bkv_c_ref[...]).reshape(B, Se, 2 * Dh)
        nk_c = kv_c[:, :, 0:Dh]
        nv_c = kv_c[:, :, Dh:2 * Dh]
        head_c = attn_core(nq_c, nk_c, nv_c, causal=False, q_off=0)
        cross_out = mm(head_c.reshape(B * Sq, Dh), wo_c_ref[...])
        second = layernorm(cross_out + first, ln_g_ref, ln_b_ref, 1)

        # ---- feed-forward ------------------------------------------------
        # TODO(synk): tile ff_w1/ff_w2 over MID on an extra 'arbitrary' grid
        # axis with a VMEM accumulator for very large middle_dim (v7x VMEM).
        hidden = jnp.maximum(mm(second, ff_w1_ref[...]), 0.0)
        ff = mm(hidden, ff_w2_ref[...])
        out = layernorm(ff + second, ln_g_ref, ln_b_ref, 2)

        # nn.Dropout layers are identity (eval/inference mode).
        if lane_dense_out:
            # Lane-dense store: (B, Sq*D) keeps the minor dim >= 128 at real
            # sizes, avoiding masked vst.msk partial stores for D < 128.
            out_ref[...] = out.reshape(B, Sq * D).astype(out_ref.dtype)
        else:
            out_ref[...] = out.reshape(B, Sq, D).astype(out_ref.dtype)

    return kernel


# ----------------------------------------------------------------- wrapper ---

def _fold_attention_params(wqkvo, mulw, mulb, num_heads):
    """Pre-fold the chained projections of the reference MultiHeadAttention."""
    D = wqkvo.shape[1]
    Dh = mulw.shape[2]
    scale = 1.0 / (float(Dh) ** 0.5)
    wq = (wqkvo[0] @ mulw[0]) * scale         # scale folded into Q
    bq = mulb[0] * scale
    wk = wqkvo[1] @ mulw[1]
    bk = mulb[1]
    wv = wqkvo[2] @ mulw[2]
    bv = mulb[2]
    # concat([head]*H) @ Wo == head @ (sum of the H identical row-blocks of Wo)
    wo = wqkvo[3].reshape(num_heads, Dh, D).sum(axis=0)       # (Dh, D)
    return wq, bq, wk, bk, wv, bv, wo


def _tpu_kind():
    try:
        return jax.devices()[0].device_kind.lower()
    except Exception:
        return ""


def decoder_forward(target, enc, pe, params, num_heads, *,
                    mxu_dtype=None, num_q_tiles=None):
    """Forward pass of the last DecoderLayer (== Decoder.forward output).

    mxu_dtype: None -> bf16 MXU operands (fast path on v5e/v6e/v7x, needs
      ~5e-2 tolerance).  Pass jnp.float32 for bit-faithful ~1e-4 checking.
    num_q_tiles: None -> 1 on single-TensorCore chips (grid is a serial loop),
      2 query-sequence tiles on v7x when the shapes allow it.
    """
    B, S, D = target.shape
    _, Se, _ = enc.shape
    Dh = D // num_heads
    M = params["ff_w1"].shape[1]

    if mxu_dtype is None:
        mxu_dtype = jnp.bfloat16
    approx_recip = (mxu_dtype != jnp.float32)

    if num_q_tiles is None:
        num_q_tiles = 2 if "v7" in _tpu_kind() else 1
    if num_q_tiles > 1:
        sq = S // num_q_tiles
        # (8,128) BlockSpec constraint + lane-dense output constraint.
        if (S % num_q_tiles != 0) or (sq % 8 != 0) or ((sq * D) % 128 != 0):
            num_q_tiles = 1
    Sq = S // num_q_tiles

    wq_s, bq_s, wk_s, bk_s, wv_s, bv_s, wo_s = _fold_attention_params(
        params["wqkvo_s"], params["mulw_s"], params["mulb_s"], num_heads)
    wq_c, bq_c, wk_c, bk_c, wv_c, bv_c, wo_c = _fold_attention_params(
        params["wqkvo_c"], params["mulw_c"], params["mulb_c"], num_heads)

    # Fused projections: one wide MXU push instead of three tiny-N (N=Dh) ones.
    wqkv_s = jnp.concatenate([wq_s, wk_s, wv_s], axis=1).astype(mxu_dtype)     # (D, 3Dh)
    bqkv_s = jnp.concatenate([bq_s, bk_s, bv_s])[None, :].astype(jnp.float32)  # (1, 3Dh)
    wq_c_m = wq_c.astype(mxu_dtype)                                            # (D, Dh)
    bq_c_m = bq_c[None, :].astype(jnp.float32)                                 # (1, Dh)
    wkv_c = jnp.concatenate([wk_c, wv_c], axis=1).astype(mxu_dtype)            # (D, 2Dh)
    bkv_c = jnp.concatenate([bk_c, bv_c])[None, :].astype(jnp.float32)         # (1, 2Dh)
    wo_s_m = wo_s.astype(mxu_dtype)
    wo_c_m = wo_c.astype(mxu_dtype)
    ff_w1 = params["ff_w1"].astype(mxu_dtype)
    ff_w2 = params["ff_w2"].astype(mxu_dtype)

    args = (target, enc, pe, wqkv_s, bqkv_s, wo_s_m,
            wq_c_m, bq_c_m, wkv_c, bkv_c, wo_c_m,
            params["ln_g"], params["ln_b"], ff_w1, ff_w2)

    # Activations: full blocks per step (self-attn K/V need every row).
    # TODO(synk): for large B, add a batch-tile grid axis so activation DMAs
    # double-buffer against the previous step's matmuls.
    act_specs = [
        pl.BlockSpec((B, S, D), lambda qi: (0, 0, 0)),    # target
        pl.BlockSpec((B, Se, D), lambda qi: (0, 0, 0)),   # enc_outputkv
    ]
    weight_shapes = [
        (S, D),            # position encoding
        (D, 3 * Dh),       # self-attn fused Wq|Wk|Wv (scale folded into Wq)
        (1, 3 * Dh),       # self-attn fused biases
        (Dh, D),           # self-attn folded Wo
        (D, Dh),           # cross-attn Wq
        (1, Dh),           # cross-attn bq
        (D, 2 * Dh),       # cross-attn fused Wk|Wv
        (1, 2 * Dh),       # cross-attn fused bk|bv
        (Dh, D),           # cross-attn folded Wo
        (3, D),            # layernorm gammas
        (3, D),            # layernorm betas
        (D, M),            # FF W1
        (M, D),            # FF W2
    ]

    def run(lane_dense_out, use_buffered):
        def wspec(shape):
            # Constant-index weights: single-buffer to halve their resident
            # VMEM footprint (matters against v7x's 64 MiB).
            if use_buffered:
                return pl.BlockSpec(shape, lambda qi: (0, 0),
                                    pipeline_mode=pl.Buffered(1))
            return pl.BlockSpec(shape, lambda qi: (0, 0))

        if lane_dense_out:
            out_shape = jax.ShapeDtypeStruct((B, S * D), jnp.float32)
            out_spec = pl.BlockSpec((B, Sq * D), lambda qi: (0, qi))
        else:
            out_shape = jax.ShapeDtypeStruct((B, S, D), jnp.float32)
            out_spec = pl.BlockSpec((B, Sq, D), lambda qi: (0, qi, 0))

        kernel = _make_decoder_layer_kernel(B, S, Se, Sq, D, Dh, mxu_dtype,
                                            approx_recip, lane_dense_out)
        grid_spec = pltpu.PrefetchScalarGridSpec(
            num_scalar_prefetch=0,
            grid=(num_q_tiles,),
            in_specs=act_specs + [wspec(s) for s in weight_shapes],
            out_specs=out_spec,
        )
        out = pl.pallas_call(
            kernel,
            out_shape=out_shape,
            grid_spec=grid_spec,
            compiler_params=pltpu.CompilerParams(
                dimension_semantics=("parallel",),
                vmem_limit_bytes=48 * 1024 * 1024),
        )(*args)
        return out.reshape(B, S, D) if lane_dense_out else out

    # Fast path first (lane-dense stores + single-buffered weights); guarded
    # fallbacks keep the kernel runnable on Mosaic builds lacking Buffered(1)
    # or the flattening shape-cast.
    attempts = ((True, hasattr(pl, "Buffered")), (True, False), (False, False))
    last_err = None
    for lane_dense_out, use_buffered in attempts:
        try:
            return run(lane_dense_out, use_buffered)
        except Exception as e:   # TODO(synk): narrow once target jax version is pinned.
            last_err = e
    raise last_err


# ----------------------------------------------------------- params / glue ---

def init_layer_params(key, D, Dh, M):
    ks = jax.random.split(key, 8)
    w = lambda k, shape: (jax.random.normal(k, shape, jnp.float32) * 0.1)
    return {
        "wqkvo_s": w(ks[0], (4, D, D)),
        "mulw_s": w(ks[1], (3, D, Dh)),
        "mulb_s": w(ks[2], (3, Dh)),
        "wqkvo_c": w(ks[3], (4, D, D)),
        "mulw_c": w(ks[4], (3, D, Dh)),
        "mulb_c": w(ks[5], (3, Dh)),
        "ln_g": jnp.ones((3, D), jnp.float32),
        "ln_b": jnp.zeros((3, D), jnp.float32),
        "ff_w1": w(ks[6], (D, M)),
        "ff_w2": w(ks[7], (M, D)),
    }


def position_encoding(D, max_seq_len):
    position = jnp.arange(max_seq_len, dtype=jnp.float32)[:, None]
    item = 1.0 / (10000.0 ** (jnp.arange(0, D, 2, dtype=jnp.float32) / D))
    tmp = position * item
    pe = jnp.zeros((max_seq_len, D), jnp.float32)
    pe = pe.at[:, 0::2].set(jnp.sin(tmp))
    pe = pe.at[:, 1::2].set(jnp.cos(tmp))
    return pe


def ref_decoder(target, enc, mask, pe, p, num_heads):
    """Pure-JAX reference mirroring the PyTorch forward (eval mode)."""
    x = target + pe[None]

    def ln(v, g, b):
        mu = v.mean(-1, keepdims=True)
        var = ((v - mu) ** 2).mean(-1, keepdims=True)
        return (v - mu) / jnp.sqrt(var + 1e-5) * g + b

    def mha(q_in, kv_in, wqkvo, mulw, mulb, m):
        q, k, v = q_in @ wqkvo[0], kv_in @ wqkvo[1], kv_in @ wqkvo[2]
        nq, nk, nv = q @ mulw[0] + mulb[0], k @ mulw[1] + mulb[1], v @ mulw[2] + mulb[2]
        s = jnp.einsum("bqd,bkd->bqk", nq, nk) / (nk.shape[-1] ** 0.5)
        if m is not None:
            s = jnp.where(m != 0.0, NEG_INF, s)
        head = jax.nn.softmax(s, -1) @ nv
        cat = jnp.concatenate([head] * num_heads, -1)
        return cat @ wqkvo[3]

    self_out = mha(x, x, p["wqkvo_s"], p["mulw_s"], p["mulb_s"], mask)
    first = ln(self_out + x, p["ln_g"][0], p["ln_b"][0])
    cross = mha(first, enc, p["wqkvo_c"], p["mulw_c"], p["mulb_c"], None)
    second = ln(cross + first, p["ln_g"][1], p["ln_b"][1])
    ff = jax.nn.relu(second @ p["ff_w1"]) @ p["ff_w2"]
    return ln(ff + second, p["ln_g"][2], p["ln_b"][2])


# -------------------------------------------------------------------- main ---

if __name__ == "__main__":
    B, S, Se, D, H, MID, L = 2, 8, 8, 32, 4, 64, 2
    MAX_SEQ_LEN = 16
    Dh = D // H

    key = jax.random.PRNGKey(0)
    k_t, k_e, k_p = jax.random.split(key, 3)
    target = jax.random.normal(k_t, (B, S, D), jnp.float32)
    enc_outputkv = jax.random.normal(k_e, (B, Se, D), jnp.float32)
    seq_mask_arr = jnp.tril(jnp.ones((S, S), jnp.float32))   # == seq_mask(S)

    # num_layers layers exist, but only the last one's output is returned.
    layer_keys = jax.random.split(k_p, L)
    layers = [init_layer_params(k, D, Dh, MID) for k in layer_keys]
    last_layer = layers[-1]

    pe = position_encoding(D, MAX_SEQ_LEN)[:S]
    ref = ref_decoder(target, enc_outputkv, seq_mask_arr, pe, last_layer, H)

    # Strict correctness: f32 MXU path (same math as reference, 1e-4).
    out_f32 = jax.block_until_ready(
        decoder_forward(target, enc_outputkv, pe, last_layer, H,
                        mxu_dtype=jnp.float32))
    assert out_f32.shape == (B, S, D)
    err_f32 = float(jnp.max(jnp.abs(out_f32 - ref)))
    assert jnp.allclose(out_f32, ref, rtol=1e-4, atol=1e-4), err_f32

    # Default fast path: bf16 MXU operands (f32 accumulation / elementwise).
    out_fast = jax.block_until_ready(
        decoder_forward(target, enc_outputkv, pe, last_layer, H))
    assert out_fast.shape == (B, S, D)
    err_fast = float(jnp.max(jnp.abs(out_fast - ref)))
    assert jnp.allclose(out_fast, ref, rtol=5e-2, atol=5e-2), err_fast

    print("KERNEL_OK")
</pallas_src>

<mosaic_0001>
module attributes {stable_mosaic.version = 11 : i64} {
  func.func @kernel(%arg0: i32, %arg1: memref<2x8x32xf32, #tpu.memory_space<vmem>>, %arg2: memref<2x8x32xf32, #tpu.memory_space<vmem>>, %arg3: memref<8x32xf32, #tpu.memory_space<vmem>>, %arg4: memref<32x24xf32, #tpu.memory_space<vmem>>, %arg5: memref<1x24xf32, #tpu.memory_space<vmem>>, %arg6: memref<8x32xf32, #tpu.memory_space<vmem>>, %arg7: memref<32x8xf32, #tpu.memory_space<vmem>>, %arg8: memref<1x8xf32, #tpu.memory_space<vmem>>, %arg9: memref<32x16xf32, #tpu.memory_space<vmem>>, %arg10: memref<1x16xf32, #tpu.memory_space<vmem>>, %arg11: memref<8x32xf32, #tpu.memory_space<vmem>>, %arg12: memref<3x32xf32, #tpu.memory_space<vmem>>, %arg13: memref<3x32xf32, #tpu.memory_space<vmem>>, %arg14: memref<32x64xf32, #tpu.memory_space<vmem>>, %arg15: memref<64x32xf32, #tpu.memory_space<vmem>>, %arg16: memref<2x256xf32, #tpu.memory_space<vmem>>) attributes {dimension_semantics = [#tpu.dimension_semantics<parallel>], iteration_bounds = array<i64: 1>, scalar_prefetch = 0 : i64, scratch_operands = 0 : i64, tpu.core_type = #tpu.core_type<tc>, window_params = [{pipeline_mode = #tpu.pipeline_mode<synchronous>, transform_indices = @transform_0, window_bounds = array<i64: 2, 8, 32>}, {pipeline_mode = #tpu.pipeline_mode<synchronous>, transform_indices = @transform_1, window_bounds = array<i64: 2, 8, 32>}, {pipeline_mode = #tpu.pipeline_mode<synchronous>, transform_indices = @transform_2, window_bounds = array<i64: 8, 32>}, {pipeline_mode = #tpu.pipeline_mode<synchronous>, transform_indices = @transform_3, window_bounds = array<i64: 32, 24>}, {pipeline_mode = #tpu.pipeline_mode<synchronous>, transform_indices = @transform_4, window_bounds = array<i64: 1, 24>}, {pipeline_mode = #tpu.pipeline_mode<synchronous>, transform_indices = @transform_5, window_bounds = array<i64: 8, 32>}, {pipeline_mode = #tpu.pipeline_mode<synchronous>, transform_indices = @transform_6, window_bounds = array<i64: 32, 8>}, {pipeline_mode = #tpu.pipeline_mode<synchronous>, transform_indices = @transform_7, window_bounds = array<i64: 1, 8>}, {pipeline_mode = #tpu.pipeline_mode<synchronous>, transform_indices = @transform_8, window_bounds = array<i64: 32, 16>}, {pipeline_mode = #tpu.pipeline_mode<synchronous>, transform_indices = @transform_9, window_bounds = array<i64: 1, 16>}, {pipeline_mode = #tpu.pipeline_mode<synchronous>, transform_indices = @transform_10, window_bounds = array<i64: 8, 32>}, {pipeline_mode = #tpu.pipeline_mode<synchronous>, transform_indices = @transform_11, window_bounds = array<i64: 3, 32>}, {pipeline_mode = #tpu.pipeline_mode<synchronous>, transform_indices = @transform_12, window_bounds = array<i64: 3, 32>}, {pipeline_mode = #tpu.pipeline_mode<synchronous>, transform_indices = @transform_13, window_bounds = array<i64: 32, 64>}, {pipeline_mode = #tpu.pipeline_mode<synchronous>, transform_indices = @transform_14, window_bounds = array<i64: 64, 32>}, {transform_indices = @transform_15, window_bounds = array<i64: 2, 256>}]} {
    %c0 = arith.constant 0 : index
    %c0_0 = arith.constant 0 : index
    %c0_1 = arith.constant 0 : index
    %0 = vector.load %arg1[%c0, %c0_0, %c0_1] : memref<2x8x32xf32, #tpu.memory_space<vmem>>, vector<2x8x32xf32>
    %c0_2 = arith.constant 0 : index
    %c0_3 = arith.constant 0 : index
    %1 = vector.load %arg3[%c0_2, %c0_3] : memref<8x32xf32, #tpu.memory_space<vmem>>, vector<8x32xf32>
    %2 = vector.shape_cast %1 : vector<8x32xf32> to vector<1x8x32xf32>
    %3 = vector.broadcast %2 : vector<1x8x32xf32> to vector<2x8x32xf32>
    %4 = arith.addf %0, %3 : vector<2x8x32xf32>
    %5 = vector.shape_cast %4 : vector<2x8x32xf32> to vector<16x32xf32>
    %c0_4 = arith.constant 0 : index
    %c0_5 = arith.constant 0 : index
    %c0_6 = arith.constant 0 : index
    %6 = vector.load %arg2[%c0_4, %c0_5, %c0_6] : memref<2x8x32xf32, #tpu.memory_space<vmem>>, vector<2x8x32xf32>
    %7 = vector.shape_cast %6 : vector<2x8x32xf32> to vector<16x32xf32>
    %c0_7 = arith.constant 0 : index
    %c0_8 = arith.constant 0 : index
    %8 = vector.load %arg4[%c0_7, %c0_8] : memref<32x24xf32, #tpu.memory_space<vmem>>, vector<32x24xf32>
    %cst = arith.constant dense<0.000000e+00> : vector<16x24xf32>
    %9 = tpu.matmul %5, %8, %cst {dimension_numbers = #tpu.dot_dimension_numbers<[1], [0], [0], [1], [0, 0, 1, 1], [], []>} : vector<16x32xf32>, vector<32x24xf32>, vector<16x24xf32> -> vector<16x24xf32>
    %c0_9 = arith.constant 0 : index
    %c0_10 = arith.constant 0 : index
    %10 = vector.load %arg5[%c0_9, %c0_10] : memref<1x24xf32, #tpu.memory_space<vmem>>, vector<1x24xf32>
    %11 = vector.broadcast %10 : vector<1x24xf32> to vector<16x24xf32>
    %12 = arith.addf %9, %11 : vector<16x24xf32>
    %13 = vector.shape_cast %12 : vector<16x24xf32> to vector<2x8x24xf32>
    %14 = vector.extract_strided_slice %13 {offsets = [0, 0, 0], sizes = [2, 8, 8], strides = [1, 1, 1]} : vector<2x8x24xf32> to vector<2x8x8xf32>
    %15 = vector.extract_strided_slice %13 {offsets = [0, 0, 8], sizes = [2, 8, 8], strides = [1, 1, 1]} : vector<2x8x24xf32> to vector<2x8x8xf32>
    %16 = vector.extract_strided_slice %13 {offsets = [0, 0, 16], sizes = [2, 8, 8], strides = [1, 1, 1]} : vector<2x8x24xf32> to vector<2x8x8xf32>
    "tpu.trace_start"() <{level = 10 : i32, message = "bqd,bkd->bqk"}> : () -> ()
    %cst_11 = arith.constant dense<0.000000e+00> : vector<2x8x8xf32>
    %17 = tpu.matmul %14, %15, %cst_11 {dimension_numbers = #tpu.dot_dimension_numbers<[2], [2], [1], [1], [0, 0, 0, 1, 1, 1], [0], [0]>} : vector<2x8x8xf32>, vector<2x8x8xf32>, vector<2x8x8xf32> -> vector<2x8x8xf32>
    "tpu.trace_stop"() : () -> ()
    %18 = tpu.iota {dimensions = array<i32: 0>} : vector<8x8xi32>
    %c0_i32 = arith.constant 0 : i32
    %19 = vector.broadcast %c0_i32 : i32 to vector<8x8xi32>
    %20 = arith.addi %18, %19 : vector<8x8xi32>
    %21 = tpu.iota {dimensions = array<i32: 1>} : vector<8x8xi32>
    %22 = arith.cmpi sle, %21, %20 : vector<8x8xi32>
    %23 = vector.shape_cast %22 : vector<8x8xi1> to vector<1x8x8xi1>
    %cst_12 = arith.constant -1.000000e+09 : f32
    %24 = vector.shape_cast %23 : vector<1x8x8xi1> to vector<1x8x8xi1>
    %25 = vector.broadcast %24 : vector<1x8x8xi1> to vector<2x8x8xi1>
    %26 = vector.broadcast %cst_12 : f32 to vector<2x8x8xf32>
    %27 = arith.select %25, %26, %17 : vector<2x8x8xi1>, vector<2x8x8xf32>
    %cst_13 = arith.constant dense<0xFF800000> : vector<2x8xf32>
    %28 = vector.multi_reduction <maximumf>, %27, %cst_13 [2] : vector<2x8x8xf32> to vector<2x8xf32>
    %29 = vector.shape_cast %28 : vector<2x8xf32> to vector<2x8x1xf32>
    %30 = vector.broadcast %29 : vector<2x8x1xf32> to vector<2x8x8xf32>
    %31 = arith.subf %27, %30 : vector<2x8x8xf32>
    %32 = math.exp %31 : vector<2x8x8xf32>
    %cst_14 = arith.constant dense<0.000000e+00> : vector<2x8xf32>
    %33 = vector.multi_reduction <add>, %32, %cst_14 [2] : vector<2x8x8xf32> to vector<2x8xf32>
    %34 = vector.shape_cast %33 : vector<2x8xf32> to vector<2x8x1xf32>
    %35 = tpu.reciprocal %34 : vector<2x8x1xf32> -> vector<2x8x1xf32>
    %36 = vector.broadcast %35 : vector<2x8x1xf32> to vector<2x8x8xf32>
    %37 = arith.mulf %32, %36 : vector<2x8x8xf32>
    "tpu.trace_start"() <{level = 10 : i32, message = "bqk,bkd->bqd"}> : () -> ()
    %cst_15 = arith.constant dense<0.000000e+00> : vector<2x8x8xf32>
    %38 = tpu.matmul %37, %16, %cst_15 {dimension_numbers = #tpu.dot_dimension_numbers<[2], [1], [1], [2], [0, 0, 0, 1, 1, 2], [0], [0]>} : vector<2x8x8xf32>, vector<2x8x8xf32>, vector<2x8x8xf32> -> vector<2x8x8xf32>
    "tpu.trace_stop"() : () -> ()
    %39 = vector.shape_cast %38 : vector<2x8x8xf32> to vector<16x8xf32>
    %c0_16 = arith.constant 0 : index
    %c0_17 = arith.constant 0 : index
    %40 = vector.load %arg6[%c0_16, %c0_17] : memref<8x32xf32, #tpu.memory_space<vmem>>, vector<8x32xf32>
    %cst_18 = arith.constant dense<0.000000e+00> : vector<16x32xf32>
    %41 = tpu.matmul %39, %40, %cst_18 {dimension_numbers = #tpu.dot_dimension_numbers<[1], [0], [0], [1], [0, 0, 1, 1], [], []>} : vector<16x8xf32>, vector<8x32xf32>, vector<16x32xf32> -> vector<16x32xf32>
    %42 = arith.addf %41, %5 : vector<16x32xf32>
    %c0_19 = arith.constant 0 : index
    %c0_20 = arith.constant 0 : index
    %43 = vector.load %arg12[%c0_19, %c0_20] : memref<3x32xf32, #tpu.memory_space<vmem>>, vector<1x32xf32>
    %c0_21 = arith.constant 0 : index
    %c0_22 = arith.constant 0 : index
    %44 = vector.load %arg13[%c0_21, %c0_22] : memref<3x32xf32, #tpu.memory_space<vmem>>, vector<1x32xf32>
    %cst_23 = arith.constant dense<0.000000e+00> : vector<16xf32>
    %45 = vector.multi_reduction <add>, %42, %cst_23 [1] : vector<16x32xf32> to vector<16xf32>
    %46 = vector.shape_cast %45 : vector<16xf32> to vector<16x1xf32>
    %cst_24 = arith.constant 3.200000e+01 : f32
    %47 = vector.broadcast %cst_24 : f32 to vector<16x1xf32>
    %48 = arith.divf %46, %47 : vector<16x1xf32>
    %49 = vector.broadcast %48 : vector<16x1xf32> to vector<16x32xf32>
    %50 = arith.subf %42, %49 : vector<16x32xf32>
    %51 = arith.mulf %50, %50 : vector<16x32xf32>
    %cst_25 = arith.constant dense<0.000000e+00> : vector<16xf32>
    %52 = vector.multi_reduction <add>, %51, %cst_25 [1] : vector<16x32xf32> to vector<16xf32>
    %53 = vector.shape_cast %52 : vector<16xf32> to vector<16x1xf32>
    %cst_26 = arith.constant 3.200000e+01 : f32
    %54 = vector.broadcast %cst_26 : f32 to vector<16x1xf32>
    %55 = arith.divf %53, %54 : vector<16x1xf32>
    %56 = vector.broadcast %48 : vector<16x1xf32> to vector<16x32xf32>
    %57 = arith.subf %42, %56 : vector<16x32xf32>
    %cst_27 = arith.constant 9.99999974E-6 : f32
    %58 = vector.broadcast %cst_27 : f32 to vector<16x1xf32>
    %59 = arith.addf %55, %58 : vector<16x1xf32>
    %60 = math.rsqrt %59 : vector<16x1xf32>
    %61 = vector.broadcast %60 : vector<16x1xf32> to vector<16x32xf32>
    %62 = arith.mulf %57, %61 : vector<16x32xf32>
    %63 = vector.broadcast %43 : vector<1x32xf32> to vector<16x32xf32>
    %64 = arith.mulf %62, %63 : vector<16x32xf32>
    %65 = vector.broadcast %44 : vector<1x32xf32> to vector<16x32xf32>
    %66 = arith.addf %64, %65 : vector<16x32xf32>
    %c0_28 = arith.constant 0 : index
    %c0_29 = arith.constant 0 : index
    %67 = vector.load %arg7[%c0_28, %c0_29] : memref<32x8xf32, #tpu.memory_space<vmem>>, vector<32x8xf32>
    %cst_30 = arith.constant dense<0.000000e+00> : vector<16x8xf32>
    %68 = tpu.matmul %66, %67, %cst_30 {dimension_numbers = #tpu.dot_dimension_numbers<[1], [0], [0], [1], [0, 0, 1, 1], [], []>} : vector<16x32xf32>, vector<32x8xf32>, vector<16x8xf32> -> vector<16x8xf32>
    %c0_31 = arith.constant 0 : index
    %c0_32 = arith.constant 0 : index
    %69 = vector.load %arg8[%c0_31, %c0_32] : memref<1x8xf32, #tpu.memory_space<vmem>>, vector<1x8xf32>
    %70 = vector.broadcast %69 : vector<1x8xf32> to vector<16x8xf32>
    %71 = arith.addf %68, %70 : vector<16x8xf32>
    %72 = vector.shape_cast %71 : vector<16x8xf32> to vector<2x8x8xf32>
    %c0_33 = arith.constant 0 : index
    %c0_34 = arith.constant 0 : index
    %73 = vector.load %arg9[%c0_33, %c0_34] : memref<32x16xf32, #tpu.memory_space<vmem>>, vector<32x16xf32>
    %cst_35 = arith.constant dense<0.000000e+00> : vector<16x16xf32>
    %74 = tpu.matmul %7, %73, %cst_35 {dimension_numbers = #tpu.dot_dimension_numbers<[1], [0], [0], [1], [0, 0, 1, 1], [], []>} : vector<16x32xf32>, vector<32x16xf32>, vector<16x16xf32> -> vector<16x16xf32>
    %c0_36 = arith.constant 0 : index
    %c0_37 = arith.constant 0 : index
    %75 = vector.load %arg10[%c0_36, %c0_37] : memref<1x16xf32, #tpu.memory_space<vmem>>, vector<1x16xf32>
    %76 = vector.broadcast %75 : vector<1x16xf32> to vector<16x16xf32>
    %77 = arith.addf %74, %76 : vector<16x16xf32>
    %78 = vector.shape_cast %77 : vector<16x16xf32> to vector<2x8x16xf32>
    %79 = vector.extract_strided_slice %78 {offsets = [0, 0, 0], sizes = [2, 8, 8], strides = [1, 1, 1]} : vector<2x8x16xf32> to vector<2x8x8xf32>
    %80 = vector.extract_strided_slice %78 {offsets = [0, 0, 8], sizes = [2, 8, 8], strides = [1, 1, 1]} : vector<2x8x16xf32> to vector<2x8x8xf32>
    "tpu.trace_start"() <{level = 10 : i32, message = "bqd,bkd->bqk"}> : () -> ()
    %cst_38 = arith.constant dense<0.000000e+00> : vector<2x8x8xf32>
    %81 = tpu.matmul %72, %79, %cst_38 {dimension_numbers = #tpu.dot_dimension_numbers<[2], [2], [1], [1], [0, 0, 0, 1, 1, 1], [0], [0]>} : vector<2x8x8xf32>, vector<2x8x8xf32>, vector<2x8x8xf32> -> vector<2x8x8xf32>
    "tpu.trace_stop"() : () -> ()
    %cst_39 = arith.constant dense<0xFF800000> : vector<2x8xf32>
    %82 = vector.multi_reduction <maximumf>, %81, %cst_39 [2] : vector<2x8x8xf32> to vector<2x8xf32>
    %83 = vector.shape_cast %82 : vector<2x8xf32> to vector<2x8x1xf32>
    %84 = vector.broadcast %83 : vector<2x8x1xf32> to vector<2x8x8xf32>
    %85 = arith.subf %81, %84 : vector<2x8x8xf32>
    %86 = math.exp %85 : vector<2x8x8xf32>
    %cst_40 = arith.constant dense<0.000000e+00> : vector<2x8xf32>
    %87 = vector.multi_reduction <add>, %86, %cst_40 [2] : vector<2x8x8xf32> to vector<2x8xf32>
    %88 = vector.shape_cast %87 : vector<2x8xf32> to vector<2x8x1xf32>
    %89 = tpu.reciprocal %88 : vector<2x8x1xf32> -> vector<2x8x1xf32>
    %90 = vector.broadcast %89 : vector<2x8x1xf32> to vector<2x8x8xf32>
    %91 = arith.mulf %86, %90 : vector<2x8x8xf32>
    "tpu.trace_start"() <{level = 10 : i32, message = "bqk,bkd->bqd"}> : () -> ()
    %cst_41 = arith.constant dense<0.000000e+00> : vector<2x8x8xf32>
    %92 = tpu.matmul %91, %80, %cst_41 {dimension_numbers = #tpu.dot_dimension_numbers<[2], [1], [1], [2], [0, 0, 0, 1, 1, 2], [0], [0]>} : vector<2x8x8xf32>, vector<2x8x8xf32>, vector<2x8x8xf32> -> vector<2x8x8xf32>
    "tpu.trace_stop"() : () -> ()
    %93 = vector.shape_cast %92 : vector<2x8x8xf32> to vector<16x8xf32>
    %c0_42 = arith.constant 0 : index
    %c0_43 = arith.constant 0 : index
    %94 = vector.load %arg11[%c0_42, %c0_43] : memref<8x32xf32, #tpu.memory_space<vmem>>, vector<8x32xf32>
    %cst_44 = arith.constant dense<0.000000e+00> : vector<16x32xf32>
    %95 = tpu.matmul %93, %94, %cst_44 {dimension_numbers = #tpu.dot_dimension_numbers<[1], [0], [0], [1], [0, 0, 1, 1], [], []>} : vector<16x8xf32>, vector<8x32xf32>, vector<16x32xf32> -> vector<16x32xf32>
    %96 = arith.addf %95, %66 : vector<16x32xf32>
    %c1 = arith.constant 1 : index
    %c0_45 = arith.constant 0 : index
    %97 = vector.load %arg12[%c1, %c0_45] : memref<3x32xf32, #tpu.memory_space<vmem>>, vector<1x32xf32>
    %c1_46 = arith.constant 1 : index
    %c0_47 = arith.constant 0 : index
    %98 = vector.load %arg13[%c1_46, %c0_47] : memref<3x32xf32, #tpu.memory_space<vmem>>, vector<1x32xf32>
    %cst_48 = arith.constant dense<0.000000e+00> : vector<16xf32>
    %99 = vector.multi_reduction <add>, %96, %cst_48 [1] : vector<16x32xf32> to vector<16xf32>
    %100 = vector.shape_cast %99 : vector<16xf32> to vector<16x1xf32>
    %cst_49 = arith.constant 3.200000e+01 : f32
    %101 = vector.broadcast %cst_49 : f32 to vector<16x1xf32>
    %102 = arith.divf %100, %101 : vector<16x1xf32>
    %103 = vector.broadcast %102 : vector<16x1xf32> to vector<16x32xf32>
    %104 = arith.subf %96, %103 : vector<16x32xf32>
    %105 = arith.mulf %104, %104 : vector<16x32xf32>
    %cst_50 = arith.constant dense<0.000000e+00> : vector<16xf32>
    %106 = vector.multi_reduction <add>, %105, %cst_50 [1] : vector<16x32xf32> to vector<16xf32>
    %107 = vector.shape_cast %106 : vector<16xf32> to vector<16x1xf32>
    %cst_51 = arith.constant 3.200000e+01 : f32
    %108 = vector.broadcast %cst_51 : f32 to vector<16x1xf32>
    %109 = arith.divf %107, %108 : vector<16x1xf32>
    %110 = vector.broadcast %102 : vector<16x1xf32> to vector<16x32xf32>
    %111 = arith.subf %96, %110 : vector<16x32xf32>
    %cst_52 = arith.constant 9.99999974E-6 : f32
    %112 = vector.broadcast %cst_52 : f32 to vector<16x1xf32>
    %113 = arith.addf %109, %112 : vector<16x1xf32>
    %114 = math.rsqrt %113 : vector<16x1xf32>
    %115 = vector.broadcast %114 : vector<16x1xf32> to vector<16x32xf32>
    %116 = arith.mulf %111, %115 : vector<16x32xf32>
    %117 = vector.broadcast %97 : vector<1x32xf32> to vector<16x32xf32>
    %118 = arith.mulf %116, %117 : vector<16x32xf32>
    %119 = vector.broadcast %98 : vector<1x32xf32> to vector<16x32xf32>
    %120 = arith.addf %118, %119 : vector<16x32xf32>
    %c0_53 = arith.constant 0 : index
    %c0_54 = arith.constant 0 : index
    %121 = vector.load %arg14[%c0_53, %c0_54] : memref<32x64xf32, #tpu.memory_space<vmem>>, vector<32x64xf32>
    %cst_55 = arith.constant dense<0.000000e+00> : vector<16x64xf32>
    %122 = tpu.matmul %120, %121, %cst_55 {dimension_numbers = #tpu.dot_dimension_numbers<[1], [0], [0], [1], [0, 0, 1, 1], [], []>} : vector<16x32xf32>, vector<32x64xf32>, vector<16x64xf32> -> vector<16x64xf32>
    %cst_56 = arith.constant 0.000000e+00 : f32
    %123 = vector.broadcast %cst_56 : f32 to vector<16x64xf32>
    %124 = arith.maximumf %122, %123 : vector<16x64xf32>
    %c0_57 = arith.constant 0 : index
    %c0_58 = arith.constant 0 : index
    %125 = vector.load %arg15[%c0_57, %c0_58] : memref<64x32xf32, #tpu.memory_space<vmem>>, vector<64x32xf32>
    %cst_59 = arith.constant dense<0.000000e+00> : vector<16x32xf32>
    %126 = tpu.matmul %124, %125, %cst_59 {dimension_numbers = #tpu.dot_dimension_numbers<[1], [0], [0], [1], [0, 0, 1, 1], [], []>} : vector<16x64xf32>, vector<64x32xf32>, vector<16x32xf32> -> vector<16x32xf32>
    %127 = arith.addf %126, %120 : vector<16x32xf32>
    %c2 = arith.constant 2 : index
    %c0_60 = arith.constant 0 : index
    %128 = vector.load %arg12[%c2, %c0_60] : memref<3x32xf32, #tpu.memory_space<vmem>>, vector<1x32xf32>
    %c2_61 = arith.constant 2 : index
    %c0_62 = arith.constant 0 : index
    %129 = vector.load %arg13[%c2_61, %c0_62] : memref<3x32xf32, #tpu.memory_space<vmem>>, vector<1x32xf32>
    %cst_63 = arith.constant dense<0.000000e+00> : vector<16xf32>
    %130 = vector.multi_reduction <add>, %127, %cst_63 [1] : vector<16x32xf32> to vector<16xf32>
    %131 = vector.shape_cast %130 : vector<16xf32> to vector<16x1xf32>
    %cst_64 = arith.constant 3.200000e+01 : f32
    %132 = vector.broadcast %cst_64 : f32 to vector<16x1xf32>
    %133 = arith.divf %131, %132 : vector<16x1xf32>
    %134 = vector.broadcast %133 : vector<16x1xf32> to vector<16x32xf32>
    %135 = arith.subf %127, %134 : vector<16x32xf32>
    %136 = arith.mulf %135, %135 : vector<16x32xf32>
    %cst_65 = arith.constant dense<0.000000e+00> : vector<16xf32>
    %137 = vector.multi_reduction <add>, %136, %cst_65 [1] : vector<16x32xf32> to vector<16xf32>
    %138 = vector.shape_cast %137 : vector<16xf32> to vector<16x1xf32>
    %cst_66 = arith.constant 3.200000e+01 : f32
    %139 = vector.broadcast %cst_66 : f32 to vector<16x1xf32>
    %140 = arith.divf %138, %139 : vector<16x1xf32>
    %141 = vector.broadcast %133 : vector<16x1xf32> to vector<16x32xf32>
    %142 = arith.subf %127, %141 : vector<16x32xf32>
    %cst_67 = arith.constant 9.99999974E-6 : f32
    %143 = vector.broadcast %cst_67 : f32 to vector<16x1xf32>
    %144 = arith.addf %140, %143 : vector<16x1xf32>
    %145 = math.rsqrt %144 : vector<16x1xf32>
    %146 = vector.broadcast %145 : vector<16x1xf32> to vector<16x32xf32>
    %147 = arith.mulf %142, %146 : vector<16x32xf32>
    %148 = vector.broadcast %128 : vector<1x32xf32> to vector<16x32xf32>
    %149 = arith.mulf %147, %148 : vector<16x32xf32>
    %150 = vector.broadcast %129 : vector<1x32xf32> to vector<16x32xf32>
    %151 = arith.addf %149, %150 : vector<16x32xf32>
    %152 = vector.shape_cast %151 : vector<16x32xf32> to vector<2x256xf32>
    %c0_68 = arith.constant 0 : index
    %c0_69 = arith.constant 0 : index
    %153 = vector.load %arg16[%c0_68, %c0_69] : memref<2x256xf32, #tpu.memory_space<vmem>>, vector<2x256xf32>
    tpu.vector_store %arg16[%c0_68, %c0_69], %152 {strides = array<i32>} : memref<2x256xf32, #tpu.memory_space<vmem>>, vector<2x256xf32>,
    return
  }
  func.func @transform_0(%arg0: i32) -> (i32, i32, i32) {
    %c0_i32 = arith.constant 0 : i32
    %c0_i32_0 = arith.constant 0 : i32
    %c0_i32_1 = arith.constant 0 : i32
    %c0_i32_2 = arith.constant 0 : i32
    return %c0_i32, %c0_i32_0, %c0_i32_1 : i32, i32, i32
  }
  func.func @transform_1(%arg0: i32) -> (i32, i32, i32) {
    %c0_i32 = arith.constant 0 : i32
    %c0_i32_0 = arith.constant 0 : i32
    %c0_i32_1 = arith.constant 0 : i32
    %c0_i32_2 = arith.constant 0 : i32
    return %c0_i32, %c0_i32_0, %c0_i32_1 : i32, i32, i32
  }
  func.func @transform_2(%arg0: i32) -> (i32, i32) {
    %c0_i32 = arith.constant 0 : i32
    %c0_i32_0 = arith.constant 0 : i32
    %c0_i32_1 = arith.constant 0 : i32
    return %c0_i32, %c0_i32_0 : i32, i32
  }
  func.func @transform_3(%arg0: i32) -> (i32, i32) {
    %c0_i32 = arith.constant 0 : i32
    %c0_i32_0 = arith.constant 0 : i32
    %c0_i32_1 = arith.constant 0 : i32
    return %c0_i32, %c0_i32_0 : i32, i32
  }
  func.func @transform_4(%arg0: i32) -> (i32, i32) {
    %c0_i32 = arith.constant 0 : i32
    %c0_i32_0 = arith.constant 0 : i32
    %c0_i32_1 = arith.constant 0 : i32
    return %c0_i32, %c0_i32_0 : i32, i32
  }
  func.func @transform_5(%arg0: i32) -> (i32, i32) {
    %c0_i32 = arith.constant 0 : i32
    %c0_i32_0 = arith.constant 0 : i32
    %c0_i32_1 = arith.constant 0 : i32
    return %c0_i32, %c0_i32_0 : i32, i32
  }
  func.func @transform_6(%arg0: i32) -> (i32, i32) {
    %c0_i32 = arith.constant 0 : i32
    %c0_i32_0 = arith.constant 0 : i32
    %c0_i32_1 = arith.constant 0 : i32
    return %c0_i32, %c0_i32_0 : i32, i32
  }
  func.func @transform_7(%arg0: i32) -> (i32, i32) {
    %c0_i32 = arith.constant 0 : i32
    %c0_i32_0 = arith.constant 0 : i32
    %c0_i32_1 = arith.constant 0 : i32
    return %c0_i32, %c0_i32_0 : i32, i32
  }
  func.func @transform_8(%arg0: i32) -> (i32, i32) {
    %c0_i32 = arith.constant 0 : i32
    %c0_i32_0 = arith.constant 0 : i32
    %c0_i32_1 = arith.constant 0 : i32
    return %c0_i32, %c0_i32_0 : i32, i32
  }
  func.func @transform_9(%arg0: i32) -> (i32, i32) {
    %c0_i32 = arith.constant 0 : i32
    %c0_i32_0 = arith.constant 0 : i32
    %c0_i32_1 = arith.constant 0 : i32
    return %c0_i32, %c0_i32_0 : i32, i32
  }
  func.func @transform_10(%arg0: i32) -> (i32, i32) {
    %c0_i32 = arith.constant 0 : i32
    %c0_i32_0 = arith.constant 0 : i32
    %c0_i32_1 = arith.constant 0 : i32
    return %c0_i32, %c0_i32_0 : i32, i32
  }
  func.func @transform_11(%arg0: i32) -> (i32, i32) {
    %c0_i32 = arith.constant 0 : i32
    %c0_i32_0 = arith.constant 0 : i32
    %c0_i32_1 = arith.constant 0 : i32
    return %c0_i32, %c0_i32_0 : i32, i32
  }
  func.func @transform_12(%arg0: i32) -> (i32, i32) {
    %c0_i32 = arith.constant 0 : i32
    %c0_i32_0 = arith.constant 0 : i32
    %c0_i32_1 = arith.constant 0 : i32
    return %c0_i32, %c0_i32_0 : i32, i32
  }
  func.func @transform_13(%arg0: i32) -> (i32, i32) {
    %c0_i32 = arith.constant 0 : i32
    %c0_i32_0 = arith.constant 0 : i32
    %c0_i32_1 = arith.constant 0 : i32
    return %c0_i32, %c0_i32_0 : i32, i32
  }
  func.func @transform_14(%arg0: i32) -> (i32, i32) {
    %c0_i32 = arith.constant 0 : i32
    %c0_i32_0 = arith.constant 0 : i32
    %c0_i32_1 = arith.constant 0 : i32
    return %c0_i32, %c0_i32_0 : i32, i32
  }
  func.func @transform_15(%arg0: i32) -> (i32, i32) {
    %c0_i32 = arith.constant 0 : i32
    %c0_i32_0 = arith.constant 0 : i32
    return %c0_i32, %arg0 : i32, i32
  }
}

module attributes {stable_mosaic.version = 11 : i64} {
  func.func @kernel(%arg0: i32, %arg1: memref<2x8x32xf32, #tpu.memory_space<vmem>>, %arg2: memref<2x8x32xf32, #tpu.memory_space<vmem>>, %arg3: memref<8x32xf32, #tpu.memory_space<vmem>>, %arg4: memref<32x24xf32, #tpu.memory_space<vmem>>, %arg5: memref<1x24xf32, #tpu.memory_space<vmem>>, %arg6: memref<8x32xf32, #tpu.memory_space<vmem>>, %arg7: memref<32x8xf32, #tpu.memory_space<vmem>>, %arg8: memref<1x8xf32, #tpu.memory_space<vmem>>, %arg9: memref<32x16xf32, #tpu.memory_space<vmem>>, %arg10: memref<1x16xf32, #tpu.memory_space<vmem>>, %arg11: memref<8x32xf32, #tpu.memory_space<vmem>>, %arg12: memref<3x32xf32, #tpu.memory_space<vmem>>, %arg13: memref<3x32xf32, #tpu.memory_space<vmem>>, %arg14: memref<32x64xf32, #tpu.memory_space<vmem>>, %arg15: memref<64x32xf32, #tpu.memory_space<vmem>>, %arg16: memref<2x256xf32, #tpu.memory_space<vmem>>) attributes {dimension_semantics = [#tpu.dimension_semantics<parallel>], iteration_bounds = array<i64: 1>, scalar_prefetch = 0 : i64, scratch_operands = 0 : i64, tpu.core_type = #tpu.core_type<tc>, window_params = [{pipeline_mode = #tpu.pipeline_mode<synchronous>, transform_indices = @transform_0, window_bounds = array<i64: 2, 8, 32>}, {pipeline_mode = #tpu.pipeline_mode<synchronous>, transform_indices = @transform_1, window_bounds = array<i64: 2, 8, 32>}, {pipeline_mode = #tpu.pipeline_mode<synchronous>, transform_indices = @transform_2, window_bounds = array<i64: 8, 32>}, {pipeline_mode = #tpu.pipeline_mode<synchronous>, transform_indices = @transform_3, window_bounds = array<i64: 32, 24>}, {pipeline_mode = #tpu.pipeline_mode<synchronous>, transform_indices = @transform_4, window_bounds = array<i64: 1, 24>}, {pipeline_mode = #tpu.pipeline_mode<synchronous>, transform_indices = @transform_5, window_bounds = array<i64: 8, 32>}, {pipeline_mode = #tpu.pipeline_mode<synchronous>, transform_indices = @transform_6, window_bounds = array<i64: 32, 8>}, {pipeline_mode = #tpu.pipeline_mode<synchronous>, transform_indices = @transform_7, window_bounds = array<i64: 1, 8>}, {pipeline_mode = #tpu.pipeline_mode<synchronous>, transform_indices = @transform_8, window_bounds = array<i64: 32, 16>}, {pipeline_mode = #tpu.pipeline_mode<synchronous>, transform_indices = @transform_9, window_bounds = array<i64: 1, 16>}, {pipeline_mode = #tpu.pipeline_mode<synchronous>, transform_indices = @transform_10, window_bounds = array<i64: 8, 32>}, {pipeline_mode = #tpu.pipeline_mode<synchronous>, transform_indices = @transform_11, window_bounds = array<i64: 3, 32>}, {pipeline_mode = #tpu.pipeline_mode<synchronous>, transform_indices = @transform_12, window_bounds = array<i64: 3, 32>}, {pipeline_mode = #tpu.pipeline_mode<synchronous>, transform_indices = @transform_13, window_bounds = array<i64: 32, 64>}, {pipeline_mode = #tpu.pipeline_mode<synchronous>, transform_indices = @transform_14, window_bounds = array<i64: 64, 32>}, {transform_indices = @transform_15, window_bounds = array<i64: 2, 256>}]} {
    %c0 = arith.constant 0 : index
    %c0_0 = arith.constant 0 : index
    %c0_1 = arith.constant 0 : index
    %0 = vector.load %arg1[%c0, %c0_0, %c0_1] : memref<2x8x32xf32, #tpu.memory_space<vmem>>, vector<2x8x32xf32>
    %c0_2 = arith.constant 0 : index
    %c0_3 = arith.constant 0 : index
    %1 = vector.load %arg3[%c0_2, %c0_3] : memref<8x32xf32, #tpu.memory_space<vmem>>, vector<8x32xf32>
    %2 = vector.shape_cast %1 : vector<8x32xf32> to vector<1x8x32xf32>
    %3 = vector.broadcast %2 : vector<1x8x32xf32> to vector<2x8x32xf32>
    %4 = arith.addf %0, %3 : vector<2x8x32xf32>
    %5 = vector.shape_cast %4 : vector<2x8x32xf32> to vector<16x32xf32>
    %c0_4 = arith.constant 0 : index
    %c0_5 = arith.constant 0 : index
    %c0_6 = arith.constant 0 : index
    %6 = vector.load %arg2[%c0_4, %c0_5, %c0_6] : memref<2x8x32xf32, #tpu.memory_space<vmem>>, vector<2x8x32xf32>
    %7 = vector.shape_cast %6 : vector<2x8x32xf32> to vector<16x32xf32>
    %c0_7 = arith.constant 0 : index
    %c0_8 = arith.constant 0 : index
    %8 = vector.load %arg4[%c0_7, %c0_8] : memref<32x24xf32, #tpu.memory_space<vmem>>, vector<32x24xf32>
    %cst = arith.constant dense<0.000000e+00> : vector<16x24xf32>
    %9 = tpu.matmul %5, %8, %cst {dimension_numbers = #tpu.dot_dimension_numbers<[1], [0], [0], [1], [0, 0, 1, 1], [], []>} : vector<16x32xf32>, vector<32x24xf32>, vector<16x24xf32> -> vector<16x24xf32>
    %c0_9 = arith.constant 0 : index
    %c0_10 = arith.constant 0 : index
    %10 = vector.load %arg5[%c0_9, %c0_10] : memref<1x24xf32, #tpu.memory_space<vmem>>, vector<1x24xf32>
    %11 = vector.broadcast %10 : vector<1x24xf32> to vector<16x24xf32>
    %12 = arith.addf %9, %11 : vector<16x24xf32>
    %13 = vector.shape_cast %12 : vector<16x24xf32> to vector<2x8x24xf32>
    %14 = vector.extract_strided_slice %13 {offsets = [0, 0, 0], sizes = [2, 8, 8], strides = [1, 1, 1]} : vector<2x8x24xf32> to vector<2x8x8xf32>
    %15 = vector.extract_strided_slice %13 {offsets = [0, 0, 8], sizes = [2, 8, 8], strides = [1, 1, 1]} : vector<2x8x24xf32> to vector<2x8x8xf32>
    %16 = vector.extract_strided_slice %13 {offsets = [0, 0, 16], sizes = [2, 8, 8], strides = [1, 1, 1]} : vector<2x8x24xf32> to vector<2x8x8xf32>
    "tpu.trace_start"() <{level = 10 : i32, message = "bqd,bkd->bqk"}> : () -> ()
    %cst_11 = arith.constant dense<0.000000e+00> : vector<2x8x8xf32>
    %17 = tpu.matmul %14, %15, %cst_11 {dimension_numbers = #tpu.dot_dimension_numbers<[2], [2], [1], [1], [0, 0, 0, 1, 1, 1], [0], [0]>} : vector<2x8x8xf32>, vector<2x8x8xf32>, vector<2x8x8xf32> -> vector<2x8x8xf32>
    "tpu.trace_stop"() : () -> ()
    %18 = tpu.iota {dimensions = array<i32: 0>} : vector<8x8xi32>
    %c0_i32 = arith.constant 0 : i32
    %19 = vector.broadcast %c0_i32 : i32 to vector<8x8xi32>
    %20 = arith.addi %18, %19 : vector<8x8xi32>
    %21 = tpu.iota {dimensions = array<i32: 1>} : vector<8x8xi32>
    %22 = arith.cmpi sle, %21, %20 : vector<8x8xi32>
    %23 = vector.shape_cast %22 : vector<8x8xi1> to vector<1x8x8xi1>
    %cst_12 = arith.constant -1.000000e+09 : f32
    %24 = vector.shape_cast %23 : vector<1x8x8xi1> to vector<1x8x8xi1>
    %25 = vector.broadcast %24 : vector<1x8x8xi1> to vector<2x8x8xi1>
    %26 = vector.broadcast %cst_12 : f32 to vector<2x8x8xf32>
    %27 = arith.select %25, %26, %17 : vector<2x8x8xi1>, vector<2x8x8xf32>
    %cst_13 = arith.constant dense<0xFF800000> : vector<2x8xf32>
    %28 = vector.multi_reduction <maximumf>, %27, %cst_13 [2] : vector<2x8x8xf32> to vector<2x8xf32>
    %29 = vector.shape_cast %28 : vector<2x8xf32> to vector<2x8x1xf32>
    %30 = vector.broadcast %29 : vector<2x8x1xf32> to vector<2x8x8xf32>
    %31 = arith.subf %27, %30 : vector<2x8x8xf32>
    %32 = math.exp %31 : vector<2x8x8xf32>
    %cst_14 = arith.constant dense<0.000000e+00> : vector<2x8xf32>
    %33 = vector.multi_reduction <add>, %32, %cst_14 [2] : vector<2x8x8xf32> to vector<2x8xf32>
    %34 = vector.shape_cast %33 : vector<2x8xf32> to vector<2x8x1xf32>
    %35 = tpu.reciprocal %34 : vector<2x8x1xf32> -> vector<2x8x1xf32>
    %36 = vector.broadcast %35 : vector<2x8x1xf32> to vector<2x8x8xf32>
    %37 = arith.mulf %32, %36 : vector<2x8x8xf32>
    "tpu.trace_start"() <{level = 10 : i32, message = "bqk,bkd->bqd"}> : () -> ()
    %cst_15 = arith.constant dense<0.000000e+00> : vector<2x8x8xf32>
    %38 = tpu.matmul %37, %16, %cst_15 {dimension_numbers = #tpu.dot_dimension_numbers<[2], [1], [1], [2], [0, 0, 0, 1, 1, 2], [0], [0]>} : vector<2x8x8xf32>, vector<2x8x8xf32>, vector<2x8x8xf32> -> vector<2x8x8xf32>
    "tpu.trace_stop"() : () -> ()
    %39 = vector.shape_cast %38 : vector<2x8x8xf32> to vector<16x8xf32>
    %c0_16 = arith.constant 0 : index
    %c0_17 = arith.constant 0 : index
    %40 = vector.load %arg6[%c0_16, %c0_17] : memref<8x32xf32, #tpu.memory_space<vmem>>, vector<8x32xf32>
    %cst_18 = arith.constant dense<0.000000e+00> : vector<16x32xf32>
    %41 = tpu.matmul %39, %40, %cst_18 {dimension_numbers = #tpu.dot_dimension_numbers<[1], [0], [0], [1], [0, 0, 1, 1], [], []>} : vector<16x8xf32>, vector<8x32xf32>, vector<16x32xf32> -> vector<16x32xf32>
    %42 = arith.addf %41, %5 : vector<16x32xf32>
    %c0_19 = arith.constant 0 : index
    %c0_20 = arith.constant 0 : index
    %43 = vector.load %arg12[%c0_19, %c0_20] : memref<3x32xf32, #tpu.memory_space<vmem>>, vector<1x32xf32>
    %c0_21 = arith.constant 0 : index
    %c0_22 = arith.constant 0 : index
    %44 = vector.load %arg13[%c0_21, %c0_22] : memref<3x32xf32, #tpu.memory_space<vmem>>, vector<1x32xf32>
    %cst_23 = arith.constant dense<0.000000e+00> : vector<16xf32>
    %45 = vector.multi_reduction <add>, %42, %cst_23 [1] : vector<16x32xf32> to vector<16xf32>
    %46 = vector.shape_cast %45 : vector<16xf32> to vector<16x1xf32>
    %cst_24 = arith.constant 3.200000e+01 : f32
    %47 = vector.broadcast %cst_24 : f32 to vector<16x1xf32>
    %48 = arith.divf %46, %47 : vector<16x1xf32>
    %49 = vector.broadcast %48 : vector<16x1xf32> to vector<16x32xf32>
    %50 = arith.subf %42, %49 : vector<16x32xf32>
    %51 = arith.mulf %50, %50 : vector<16x32xf32>
    %cst_25 = arith.constant dense<0.000000e+00> : vector<16xf32>
    %52 = vector.multi_reduction <add>, %51, %cst_25 [1] : vector<16x32xf32> to vector<16xf32>
    %53 = vector.shape_cast %52 : vector<16xf32> to vector<16x1xf32>
    %cst_26 = arith.constant 3.200000e+01 : f32
    %54 = vector.broadcast %cst_26 : f32 to vector<16x1xf32>
    %55 = arith.divf %53, %54 : vector<16x1xf32>
    %56 = vector.broadcast %48 : vector<16x1xf32> to vector<16x32xf32>
    %57 = arith.subf %42, %56 : vector<16x32xf32>
    %cst_27 = arith.constant 9.99999974E-6 : f32
    %58 = vector.broadcast %cst_27 : f32 to vector<16x1xf32>
    %59 = arith.addf %55, %58 : vector<16x1xf32>
    %60 = math.rsqrt %59 : vector<16x1xf32>
    %61 = vector.broadcast %60 : vector<16x1xf32> to vector<16x32xf32>
    %62 = arith.mulf %57, %61 : vector<16x32xf32>
    %63 = vector.broadcast %43 : vector<1x32xf32> to vector<16x32xf32>
    %64 = arith.mulf %62, %63 : vector<16x32xf32>
    %65 = vector.broadcast %44 : vector<1x32xf32> to vector<16x32xf32>
    %66 = arith.addf %64, %65 : vector<16x32xf32>
    %c0_28 = arith.constant 0 : index
    %c0_29 = arith.constant 0 : index
    %67 = vector.load %arg7[%c0_28, %c0_29] : memref<32x8xf32, #tpu.memory_space<vmem>>, vector<32x8xf32>
    %cst_30 = arith.constant dense<0.000000e+00> : vector<16x8xf32>
    %68 = tpu.matmul %66, %67, %cst_30 {dimension_numbers = #tpu.dot_dimension_numbers<[1], [0], [0], [1], [0, 0, 1, 1], [], []>} : vector<16x32xf32>, vector<32x8xf32>, vector<16x8xf32> -> vector<16x8xf32>
    %c0_31 = arith.constant 0 : index
    %c0_32 = arith.constant 0 : index
    %69 = vector.load %arg8[%c0_31, %c0_32] : memref<1x8xf32, #tpu.memory_space<vmem>>, vector<1x8xf32>
    %70 = vector.broadcast %69 : vector<1x8xf32> to vector<16x8xf32>
    %71 = arith.addf %68, %70 : vector<16x8xf32>
    %72 = vector.shape_cast %71 : vector<16x8xf32> to vector<2x8x8xf32>
    %c0_33 = arith.constant 0 : index
    %c0_34 = arith.constant 0 : index
    %73 = vector.load %arg9[%c0_33, %c0_34] : memref<32x16xf32, #tpu.memory_space<vmem>>, vector<32x16xf32>
    %cst_35 = arith.constant dense<0.000000e+00> : vector<16x16xf32>
    %74 = tpu.matmul %7, %73, %cst_35 {dimension_numbers = #tpu.dot_dimension_numbers<[1], [0], [0], [1], [0, 0, 1, 1], [], []>} : vector<16x32xf32>, vector<32x16xf32>, vector<16x16xf32> -> vector<16x16xf32>
    %c0_36 = arith.constant 0 : index
    %c0_37 = arith.constant 0 : index
    %75 = vector.load %arg10[%c0_36, %c0_37] : memref<1x16xf32, #tpu.memory_space<vmem>>, vector<1x16xf32>
    %76 = vector.broadcast %75 : vector<1x16xf32> to vector<16x16xf32>
    %77 = arith.addf %74, %76 : vector<16x16xf32>
    %78 = vector.shape_cast %77 : vector<16x16xf32> to vector<2x8x16xf32>
    %79 = vector.extract_strided_slice %78 {offsets = [0, 0, 0], sizes = [2, 8, 8], strides = [1, 1, 1]} : vector<2x8x16xf32> to vector<2x8x8xf32>
    %80 = vector.extract_strided_slice %78 {offsets = [0, 0, 8], sizes = [2, 8, 8], strides = [1, 1, 1]} : vector<2x8x16xf32> to vector<2x8x8xf32>
    "tpu.trace_start"() <{level = 10 : i32, message = "bqd,bkd->bqk"}> : () -> ()
    %cst_38 = arith.constant dense<0.000000e+00> : vector<2x8x8xf32>
    %81 = tpu.matmul %72, %79, %cst_38 {dimension_numbers = #tpu.dot_dimension_numbers<[2], [2], [1], [1], [0, 0, 0, 1, 1, 1], [0], [0]>} : vector<2x8x8xf32>, vector<2x8x8xf32>, vector<2x8x8xf32> -> vector<2x8x8xf32>
    "tpu.trace_stop"() : () -> ()
    %cst_39 = arith.constant dense<0xFF800000> : vector<2x8xf32>
    %82 = vector.multi_reduction <maximumf>, %81, %cst_39 [2] : vector<2x8x8xf32> to vector<2x8xf32>
    %83 = vector.shape_cast %82 : vector<2x8xf32> to vector<2x8x1xf32>
    %84 = vector.broadcast %83 : vector<2x8x1xf32> to vector<2x8x8xf32>
    %85 = arith.subf %81, %84 : vector<2x8x8xf32>
    %86 = math.exp %85 : vector<2x8x8xf32>
    %cst_40 = arith.constant dense<0.000000e+00> : vector<2x8xf32>
    %87 = vector.multi_reduction <add>, %86, %cst_40 [2] : vector<2x8x8xf32> to vector<2x8xf32>
    %88 = vector.shape_cast %87 : vector<2x8xf32> to vector<2x8x1xf32>
    %89 = tpu.reciprocal %88 : vector<2x8x1xf32> -> vector<2x8x1xf32>
    %90 = vector.broadcast %89 : vector<2x8x1xf32> to vector<2x8x8xf32>
    %91 = arith.mulf %86, %90 : vector<2x8x8xf32>
    "tpu.trace_start"() <{level = 10 : i32, message = "bqk,bkd->bqd"}> : () -> ()
    %cst_41 = arith.constant dense<0.000000e+00> : vector<2x8x8xf32>
    %92 = tpu.matmul %91, %80, %cst_41 {dimension_numbers = #tpu.dot_dimension_numbers<[2], [1], [1], [2], [0, 0, 0, 1, 1, 2], [0], [0]>} : vector<2x8x8xf32>, vector<2x8x8xf32>, vector<2x8x8xf32> -> vector<2x8x8xf32>
    "tpu.trace_stop"() : () -> ()
    %93 = vector.shape_cast %92 : vector<2x8x8xf32> to vector<16x8xf32>
    %c0_42 = arith.constant 0 : index
    %c0_43 = arith.constant 0 : index
    %94 = vector.load %arg11[%c0_42, %c0_43] : memref<8x32xf32, #tpu.memory_space<vmem>>, vector<8x32xf32>
    %cst_44 = arith.constant dense<0.000000e+00> : vector<16x32xf32>
    %95 = tpu.matmul %93, %94, %cst_44 {dimension_numbers = #tpu.dot_dimension_numbers<[1], [0], [0], [1], [0, 0, 1, 1], [], []>} : vector<16x8xf32>, vector<8x32xf32>, vector<16x32xf32> -> vector<16x32xf32>
    %96 = arith.addf %95, %66 : vector<16x32xf32>
    %c1 = arith.constant 1 : index
    %c0_45 = arith.constant 0 : index
    %97 = vector.load %arg12[%c1, %c0_45] : memref<3x32xf32, #tpu.memory_space<vmem>>, vector<1x32xf32>
    %c1_46 = arith.constant 1 : index
    %c0_47 = arith.constant 0 : index
    %98 = vector.load %arg13[%c1_46, %c0_47] : memref<3x32xf32, #tpu.memory_space<vmem>>, vector<1x32xf32>
    %cst_48 = arith.constant dense<0.000000e+00> : vector<16xf32>
    %99 = vector.multi_reduction <add>, %96, %cst_48 [1] : vector<16x32xf32> to vector<16xf32>
    %100 = vector.shape_cast %99 : vector<16xf32> to vector<16x1xf32>
    %cst_49 = arith.constant 3.200000e+01 : f32
    %101 = vector.broadcast %cst_49 : f32 to vector<16x1xf32>
    %102 = arith.divf %100, %101 : vector<16x1xf32>
    %103 = vector.broadcast %102 : vector<16x1xf32> to vector<16x32xf32>
    %104 = arith.subf %96, %103 : vector<16x32xf32>
    %105 = arith.mulf %104, %104 : vector<16x32xf32>
    %cst_50 = arith.constant dense<0.000000e+00> : vector<16xf32>
    %106 = vector.multi_reduction <add>, %105, %cst_50 [1] : vector<16x32xf32> to vector<16xf32>
    %107 = vector.shape_cast %106 : vector<16xf32> to vector<16x1xf32>
    %cst_51 = arith.constant 3.200000e+01 : f32
    %108 = vector.broadcast %cst_51 : f32 to vector<16x1xf32>
    %109 = arith.divf %107, %108 : vector<16x1xf32>
    %110 = vector.broadcast %102 : vector<16x1xf32> to vector<16x32xf32>
    %111 = arith.subf %96, %110 : vector<16x32xf32>
    %cst_52 = arith.constant 9.99999974E-6 : f32
    %112 = vector.broadcast %cst_52 : f32 to vector<16x1xf32>
    %113 = arith.addf %109, %112 : vector<16x1xf32>
    %114 = math.rsqrt %113 : vector<16x1xf32>
    %115 = vector.broadcast %114 : vector<16x1xf32> to vector<16x32xf32>
    %116 = arith.mulf %111, %115 : vector<16x32xf32>
    %117 = vector.broadcast %97 : vector<1x32xf32> to vector<16x32xf32>
    %118 = arith.mulf %116, %117 : vector<16x32xf32>
    %119 = vector.broadcast %98 : vector<1x32xf32> to vector<16x32xf32>
    %120 = arith.addf %118, %119 : vector<16x32xf32>
    %c0_53 = arith.constant 0 : index
    %c0_54 = arith.constant 0 : index
    %121 = vector.load %arg14[%c0_53, %c0_54] : memref<32x64xf32, #tpu.memory_space<vmem>>, vector<32x64xf32>
    %cst_55 = arith.constant dense<0.000000e+00> : vector<16x64xf32>
    %122 = tpu.matmul %120, %121, %cst_55 {dimension_numbers = #tpu.dot_dimension_numbers<[1], [0], [0], [1], [0, 0, 1, 1], [], []>} : vector<16x32xf32>, vector<32x64xf32>, vector<16x64xf32> -> vector<16x64xf32>
    %cst_56 = arith.constant 0.000000e+00 : f32
    %123 = vector.broadcast %cst_56 : f32 to vector<16x64xf32>
    %124 = arith.maximumf %122, %123 : vector<16x64xf32>
    %c0_57 = arith.constant 0 : index
    %c0_58 = arith.constant 0 : index
    %125 = vector.load %arg15[%c0_57, %c0_58] : memref<64x32xf32, #tpu.memory_space<vmem>>, vector<64x32xf32>
    %cst_59 = arith.constant dense<0.000000e+00> : vector<16x32xf32>
    %126 = tpu.matmul %124, %125, %cst_59 {dimension_numbers = #tpu.dot_dimension_numbers<[1], [0], [0], [1], [0, 0, 1, 1], [], []>} : vector<16x64xf32>, vector<64x32xf32>, vector<16x32xf32> -> vector<16x32xf32>
    %127 = arith.addf %126, %120 : vector<16x32xf32>
    %c2 = arith.constant 2 : index
    %c0_60 = arith.constant 0 : index
    %128 = vector.load %arg12[%c2, %c0_60] : memref<3x32xf32, #tpu.memory_space<vmem>>, vector<1x32xf32>
    %c2_61 = arith.constant 2 : index
    %c0_62 = arith.constant 0 : index
    %129 = vector.load %arg13[%c2_61, %c0_62] : memref<3x32xf32, #tpu.memory_space<vmem>>, vector<1x32xf32>
    %cst_63 = arith.constant dense<0.000000e+00> : vector<16xf32>
    %130 = vector.multi_reduction <add>, %127, %cst_63 [1] : vector<16x32xf32> to vector<16xf32>
    %131 = vector.shape_cast %130 : vector<16xf32> to vector<16x1xf32>
    %cst_64 = arith.constant 3.200000e+01 : f32
    %132 = vector.broadcast %cst_64 : f32 to vector<16x1xf32>
    %133 = arith.divf %131, %132 : vector<16x1xf32>
    %134 = vector.broadcast %133 : vector<16x1xf32> to vector<16x32xf32>
    %135 = arith.subf %127, %134 : vector<16x32xf32>
    %136 = arith.mulf %135, %135 : vector<16x32xf32>
    %cst_65 = arith.constant dense<0.000000e+00> : vector<16xf32>
    %137 = vector.multi_reduction <add>, %136, %cst_65 [1] : vector<16x32xf32> to vector<16xf32>
    %138 = vector.shape_cast %137 : vector<16xf32> to vector<16x1xf32>
    %cst_66 = arith.constant 3.200000e+01 : f32
    %139 = vector.broadcast %cst_66 : f32 to vector<16x1xf32>
    %140 = arith.divf %138, %139 : vector<16x1xf32>
    %141 = vector.broadcast %133 : vector<16x1xf32> to vector<16x32xf32>
    %142 = arith.subf %127, %141 : vector<16x32xf32>
    %cst_67 = arith.constant 9.99999974E-6 : f32
    %143 = vector.broadcast %cst_67 : f32 to vector<16x1xf32>
    %144 = arith.addf %140, %143 : vector<16x1xf32>
    %145 = math.rsqrt %144 : vector<16x1xf32>
    %146 = vector.broadcast %145 : vector<16x1xf32> to vector<16x32xf32>
    %147 = arith.mulf %142, %146 : vector<16x32xf32>
    %148 = vector.broadcast %128 : vector<1x32xf32> to vector<16x32xf32>
    %149 = arith.mulf %147, %148 : vector<16x32xf32>
    %150 = vector.broadcast %129 : vector<1x32xf32> to vector<16x32xf32>
    %151 = arith.addf %149, %150 : vector<16x32xf32>
    %152 = vector.shape_cast %151 : vector<16x32xf32> to vector<2x256xf32>
    %c0_68 = arith.constant 0 : index
    %c0_69 = arith.constant 0 : index
    %153 = vector.load %arg16[%c0_68, %c0_69] : memref<2x256xf32, #tpu.memory_space<vmem>>, vector<2x256xf32>
    tpu.vector_store %arg16[%c0_68, %c0_69], %152 {strides = array<i32>} : memref<2x256xf32, #tpu.memory_space<vmem>>, vector<2x256xf32>,
    return
  }
  func.func @transform_0(%arg0: i32) -> (i32, i32, i32) {
    %c0_i32 = arith.constant 0 : i32
    %c0_i32_0 = arith.constant 0 : i32
    %c0_i32_1 = arith.constant 0 : i32
    %c0_i32_2 = arith.constant 0 : i32
    return %c0_i32, %c0_i32_0, %c0_i32_1 : i32, i32, i32
  }
  func.func @transform_1(%arg0: i32) -> (i32, i32, i32) {
    %c0_i32 = arith.constant 0 : i32
    %c0_i32_0 = arith.constant 0 : i32
    %c0_i32_1 = arith.constant 0 : i32
    %c0_i32_2 = arith.constant 0 : i32
    return %c0_i32, %c0_i32_0, %c0_i32_1 : i32, i32, i32
  }
  func.func @transform_2(%arg0: i32) -> (i32, i32) {
    %c0_i32 = arith.constant 0 : i32
    %c0_i32_0 = arith.constant 0 : i32
    %c0_i32_1 = arith.constant 0 : i32
    return %c0_i32, %c0_i32_0 : i32, i32
  }
  func.func @transform_3(%arg0: i32) -> (i32, i32) {
    %c0_i32 = arith.constant 0 : i32
    %c0_i32_0 = arith.constant 0 : i32
    %c0_i32_1 = arith.constant 0 : i32
    return %c0_i32, %c0_i32_0 : i32, i32
  }
  func.func @transform_4(%arg0: i32) -> (i32, i32) {
    %c0_i32 = arith.constant 0 : i32
    %c0_i32_0 = arith.constant 0 : i32
    %c0_i32_1 = arith.constant 0 : i32
    return %c0_i32, %c0_i32_0 : i32, i32
  }
  func.func @transform_5(%arg0: i32) -> (i32, i32) {
    %c0_i32 = arith.constant 0 : i32
    %c0_i32_0 = arith.constant 0 : i32
    %c0_i32_1 = arith.constant 0 : i32
    return %c0_i32, %c0_i32_0 : i32, i32
  }
  func.func @transform_6(%arg0: i32) -> (i32, i32) {
    %c0_i32 = arith.constant 0 : i32
    %c0_i32_0 = arith.constant 0 : i32
    %c0_i32_1 = arith.constant 0 : i32
    return %c0_i32, %c0_i32_0 : i32, i32
  }
  func.func @transform_7(%arg0: i32) -> (i32, i32) {
    %c0_i32 = arith.constant 0 : i32
    %c0_i32_0 = arith.constant 0 : i32
    %c0_i32_1 = arith.constant 0 : i32
    return %c0_i32, %c0_i32_0 : i32, i32
  }
  func.func @transform_8(%arg0: i32) -> (i32, i32) {
    %c0_i32 = arith.constant 0 : i32
    %c0_i32_0 = arith.constant 0 : i32
    %c0_i32_1 = arith.constant 0 : i32
    return %c0_i32, %c0_i32_0 : i32, i32
  }
  func.func @transform_9(%arg0: i32) -> (i32, i32) {
    %c0_i32 = arith.constant 0 : i32
    %c0_i32_0 = arith.constant 0 : i32
    %c0_i32_1 = arith.constant 0 : i32
    return %c0_i32, %c0_i32_0 : i32, i32
  }
  func.func @transform_10(%arg0: i32) -> (i32, i32) {
    %c0_i32 = arith.constant 0 : i32
    %c0_i32_0 = arith.constant 0 : i32
    %c0_i32_1 = arith.constant 0 : i32
    return %c0_i32, %c0_i32_0 : i32, i32
  }
  func.func @transform_11(%arg0: i32) -> (i32, i32) {
    %c0_i32 = arith.constant 0 : i32
    %c0_i32_0 = arith.constant 0 : i32
    %c0_i32_1 = arith.constant 0 : i32
    return %c0_i32, %c0_i32_0 : i32, i32
  }
  func.func @transform_12(%arg0: i32) -> (i32, i32) {
    %c0_i32 = arith.constant 0 : i32
    %c0_i32_0 = arith.constant 0 : i32
    %c0_i32_1 = arith.constant 0 : i32
    return %c0_i32, %c0_i32_0 : i32, i32
  }
  func.func @transform_13(%arg0: i32) -> (i32, i32) {
    %c0_i32 = arith.constant 0 : i32
    %c0_i32_0 = arith.constant 0 : i32
    %c0_i32_1 = arith.constant 0 : i32
    return %c0_i32, %c0_i32_0 : i32, i32
  }
  func.func @transform_14(%arg0: i32) -> (i32, i32) {
    %c0_i32 = arith.constant 0 : i32
    %c0_i32_0 = arith.constant 0 : i32
    %c0_i32_1 = arith.constant 0 : i32
    return %c0_i32, %c0_i32_0 : i32, i32
  }
  func.func @transform_15(%arg0: i32) -> (i32, i32) {
    %c0_i32 = arith.constant 0 : i32
    %c0_i32_0 = arith.constant 0 : i32
    return %c0_i32, %arg0 : i32, i32
  }
}

module attributes {stable_mosaic.version = 11 : i64} {
  func.func @kernel(%arg0: i32, %arg1: memref<2x8x32xf32, #tpu.memory_space<vmem>>, %arg2: memref<2x8x32xf32, #tpu.memory_space<vmem>>, %arg3: memref<8x32xf32, #tpu.memory_space<vmem>>, %arg4: memref<32x24xf32, #tpu.memory_space<vmem>>, %arg5: memref<1x24xf32, #tpu.memory_space<vmem>>, %arg6: memref<8x32xf32, #tpu.memory_space<vmem>>, %arg7: memref<32x8xf32, #tpu.memory_space<vmem>>, %arg8: memref<1x8xf32, #tpu.memory_space<vmem>>, %arg9: memref<32x16xf32, #tpu.memory_space<vmem>>, %arg10: memref<1x16xf32, #tpu.memory_space<vmem>>, %arg11: memref<8x32xf32, #tpu.memory_space<vmem>>, %arg12: memref<3x32xf32, #tpu.memory_space<vmem>>, %arg13: memref<3x32xf32, #tpu.memory_space<vmem>>, %arg14: memref<32x64xf32, #tpu.memory_space<vmem>>, %arg15: memref<64x32xf32, #tpu.memory_space<vmem>>, %arg16: memref<2x8x32xf32, #tpu.memory_space<vmem>>) attributes {dimension_semantics = [#tpu.dimension_semantics<parallel>], iteration_bounds = array<i64: 1>, scalar_prefetch = 0 : i64, scratch_operands = 0 : i64, tpu.core_type = #tpu.core_type<tc>, window_params = [{pipeline_mode = #tpu.pipeline_mode<synchronous>, transform_indices = @transform_0, window_bounds = array<i64: 2, 8, 32>}, {pipeline_mode = #tpu.pipeline_mode<synchronous>, transform_indices = @transform_1, window_bounds = array<i64: 2, 8, 32>}, {pipeline_mode = #tpu.pipeline_mode<synchronous>, transform_indices = @transform_2, window_bounds = array<i64: 8, 32>}, {pipeline_mode = #tpu.pipeline_mode<synchronous>, transform_indices = @transform_3, window_bounds = array<i64: 32, 24>}, {pipeline_mode = #tpu.pipeline_mode<synchronous>, transform_indices = @transform_4, window_bounds = array<i64: 1, 24>}, {pipeline_mode = #tpu.pipeline_mode<synchronous>, transform_indices = @transform_5, window_bounds = array<i64: 8, 32>}, {pipeline_mode = #tpu.pipeline_mode<synchronous>, transform_indices = @transform_6, window_bounds = array<i64: 32, 8>}, {pipeline_mode = #tpu.pipeline_mode<synchronous>, transform_indices = @transform_7, window_bounds = array<i64: 1, 8>}, {pipeline_mode = #tpu.pipeline_mode<synchronous>, transform_indices = @transform_8, window_bounds = array<i64: 32, 16>}, {pipeline_mode = #tpu.pipeline_mode<synchronous>, transform_indices = @transform_9, window_bounds = array<i64: 1, 16>}, {pipeline_mode = #tpu.pipeline_mode<synchronous>, transform_indices = @transform_10, window_bounds = array<i64: 8, 32>}, {pipeline_mode = #tpu.pipeline_mode<synchronous>, transform_indices = @transform_11, window_bounds = array<i64: 3, 32>}, {pipeline_mode = #tpu.pipeline_mode<synchronous>, transform_indices = @transform_12, window_bounds = array<i64: 3, 32>}, {pipeline_mode = #tpu.pipeline_mode<synchronous>, transform_indices = @transform_13, window_bounds = array<i64: 32, 64>}, {pipeline_mode = #tpu.pipeline_mode<synchronous>, transform_indices = @transform_14, window_bounds = array<i64: 64, 32>}, {transform_indices = @transform_15, window_bounds = array<i64: 2, 8, 32>}]} {
    %c0 = arith.constant 0 : index
    %c0_0 = arith.constant 0 : index
    %c0_1 = arith.constant 0 : index
    %0 = vector.load %arg1[%c0, %c0_0, %c0_1] : memref<2x8x32xf32, #tpu.memory_space<vmem>>, vector<2x8x32xf32>
    %c0_2 = arith.constant 0 : index
    %c0_3 = arith.constant 0 : index
    %1 = vector.load %arg3[%c0_2, %c0_3] : memref<8x32xf32, #tpu.memory_space<vmem>>, vector<8x32xf32>
    %2 = vector.shape_cast %1 : vector<8x32xf32> to vector<1x8x32xf32>
    %3 = vector.broadcast %2 : vector<1x8x32xf32> to vector<2x8x32xf32>
    %4 = arith.addf %0, %3 : vector<2x8x32xf32>
    %5 = vector.shape_cast %4 : vector<2x8x32xf32> to vector<16x32xf32>
    %c0_4 = arith.constant 0 : index
    %c0_5 = arith.constant 0 : index
    %c0_6 = arith.constant 0 : index
    %6 = vector.load %arg2[%c0_4, %c0_5, %c0_6] : memref<2x8x32xf32, #tpu.memory_space<vmem>>, vector<2x8x32xf32>
    %7 = vector.shape_cast %6 : vector<2x8x32xf32> to vector<16x32xf32>
    %c0_7 = arith.constant 0 : index
    %c0_8 = arith.constant 0 : index
    %8 = vector.load %arg4[%c0_7, %c0_8] : memref<32x24xf32, #tpu.memory_space<vmem>>, vector<32x24xf32>
    %cst = arith.constant dense<0.000000e+00> : vector<16x24xf32>
    %9 = tpu.matmul %5, %8, %cst {dimension_numbers = #tpu.dot_dimension_numbers<[1], [0], [0], [1], [0, 0, 1, 1], [], []>} : vector<16x32xf32>, vector<32x24xf32>, vector<16x24xf32> -> vector<16x24xf32>
    %c0_9 = arith.constant 0 : index
    %c0_10 = arith.constant 0 : index
    %10 = vector.load %arg5[%c0_9, %c0_10] : memref<1x24xf32, #tpu.memory_space<vmem>>, vector<1x24xf32>
    %11 = vector.broadcast %10 : vector<1x24xf32> to vector<16x24xf32>
    %12 = arith.addf %9, %11 : vector<16x24xf32>
    %13 = vector.shape_cast %12 : vector<16x24xf32> to vector<2x8x24xf32>
    %14 = vector.extract_strided_slice %13 {offsets = [0, 0, 0], sizes = [2, 8, 8], strides = [1, 1, 1]} : vector<2x8x24xf32> to vector<2x8x8xf32>
    %15 = vector.extract_strided_slice %13 {offsets = [0, 0, 8], sizes = [2, 8, 8], strides = [1, 1, 1]} : vector<2x8x24xf32> to vector<2x8x8xf32>
    %16 = vector.extract_strided_slice %13 {offsets = [0, 0, 16], sizes = [2, 8, 8], strides = [1, 1, 1]} : vector<2x8x24xf32> to vector<2x8x8xf32>
    "tpu.trace_start"() <{level = 10 : i32, message = "bqd,bkd->bqk"}> : () -> ()
    %cst_11 = arith.constant dense<0.000000e+00> : vector<2x8x8xf32>
    %17 = tpu.matmul %14, %15, %cst_11 {dimension_numbers = #tpu.dot_dimension_numbers<[2], [2], [1], [1], [0, 0, 0, 1, 1, 1], [0], [0]>} : vector<2x8x8xf32>, vector<2x8x8xf32>, vector<2x8x8xf32> -> vector<2x8x8xf32>
    "tpu.trace_stop"() : () -> ()
    %18 = tpu.iota {dimensions = array<i32: 0>} : vector<8x8xi32>
    %c0_i32 = arith.constant 0 : i32
    %19 = vector.broadcast %c0_i32 : i32 to vector<8x8xi32>
    %20 = arith.addi %18, %19 : vector<8x8xi32>
    %21 = tpu.iota {dimensions = array<i32: 1>} : vector<8x8xi32>
    %22 = arith.cmpi sle, %21, %20 : vector<8x8xi32>
    %23 = vector.shape_cast %22 : vector<8x8xi1> to vector<1x8x8xi1>
    %cst_12 = arith.constant -1.000000e+09 : f32
    %24 = vector.shape_cast %23 : vector<1x8x8xi1> to vector<1x8x8xi1>
    %25 = vector.broadcast %24 : vector<1x8x8xi1> to vector<2x8x8xi1>
    %26 = vector.broadcast %cst_12 : f32 to vector<2x8x8xf32>
    %27 = arith.select %25, %26, %17 : vector<2x8x8xi1>, vector<2x8x8xf32>
    %cst_13 = arith.constant dense<0xFF800000> : vector<2x8xf32>
    %28 = vector.multi_reduction <maximumf>, %27, %cst_13 [2] : vector<2x8x8xf32> to vector<2x8xf32>
    %29 = vector.shape_cast %28 : vector<2x8xf32> to vector<2x8x1xf32>
    %30 = vector.broadcast %29 : vector<2x8x1xf32> to vector<2x8x8xf32>
    %31 = arith.subf %27, %30 : vector<2x8x8xf32>
    %32 = math.exp %31 : vector<2x8x8xf32>
    %cst_14 = arith.constant dense<0.000000e+00> : vector<2x8xf32>
    %33 = vector.multi_reduction <add>, %32, %cst_14 [2] : vector<2x8x8xf32> to vector<2x8xf32>
    %34 = vector.shape_cast %33 : vector<2x8xf32> to vector<2x8x1xf32>
    %35 = tpu.reciprocal %34 : vector<2x8x1xf32> -> vector<2x8x1xf32>
    %36 = vector.broadcast %35 : vector<2x8x1xf32> to vector<2x8x8xf32>
    %37 = arith.mulf %32, %36 : vector<2x8x8xf32>
    "tpu.trace_start"() <{level = 10 : i32, message = "bqk,bkd->bqd"}> : () -> ()
    %cst_15 = arith.constant dense<0.000000e+00> : vector<2x8x8xf32>
    %38 = tpu.matmul %37, %16, %cst_15 {dimension_numbers = #tpu.dot_dimension_numbers<[2], [1], [1], [2], [0, 0, 0, 1, 1, 2], [0], [0]>} : vector<2x8x8xf32>, vector<2x8x8xf32>, vector<2x8x8xf32> -> vector<2x8x8xf32>
    "tpu.trace_stop"() : () -> ()
    %39 = vector.shape_cast %38 : vector<2x8x8xf32> to vector<16x8xf32>
    %c0_16 = arith.constant 0 : index
    %c0_17 = arith.constant 0 : index
    %40 = vector.load %arg6[%c0_16, %c0_17] : memref<8x32xf32, #tpu.memory_space<vmem>>, vector<8x32xf32>
    %cst_18 = arith.constant dense<0.000000e+00> : vector<16x32xf32>
    %41 = tpu.matmul %39, %40, %cst_18 {dimension_numbers = #tpu.dot_dimension_numbers<[1], [0], [0], [1], [0, 0, 1, 1], [], []>} : vector<16x8xf32>, vector<8x32xf32>, vector<16x32xf32> -> vector<16x32xf32>
    %42 = arith.addf %41, %5 : vector<16x32xf32>
    %c0_19 = arith.constant 0 : index
    %c0_20 = arith.constant 0 : index
    %43 = vector.load %arg12[%c0_19, %c0_20] : memref<3x32xf32, #tpu.memory_space<vmem>>, vector<1x32xf32>
    %c0_21 = arith.constant 0 : index
    %c0_22 = arith.constant 0 : index
    %44 = vector.load %arg13[%c0_21, %c0_22] : memref<3x32xf32, #tpu.memory_space<vmem>>, vector<1x32xf32>
    %cst_23 = arith.constant dense<0.000000e+00> : vector<16xf32>
    %45 = vector.multi_reduction <add>, %42, %cst_23 [1] : vector<16x32xf32> to vector<16xf32>
    %46 = vector.shape_cast %45 : vector<16xf32> to vector<16x1xf32>
    %cst_24 = arith.constant 3.200000e+01 : f32
    %47 = vector.broadcast %cst_24 : f32 to vector<16x1xf32>
    %48 = arith.divf %46, %47 : vector<16x1xf32>
    %49 = vector.broadcast %48 : vector<16x1xf32> to vector<16x32xf32>
    %50 = arith.subf %42, %49 : vector<16x32xf32>
    %51 = arith.mulf %50, %50 : vector<16x32xf32>
    %cst_25 = arith.constant dense<0.000000e+00> : vector<16xf32>
    %52 = vector.multi_reduction <add>, %51, %cst_25 [1] : vector<16x32xf32> to vector<16xf32>
    %53 = vector.shape_cast %52 : vector<16xf32> to vector<16x1xf32>
    %cst_26 = arith.constant 3.200000e+01 : f32
    %54 = vector.broadcast %cst_26 : f32 to vector<16x1xf32>
    %55 = arith.divf %53, %54 : vector<16x1xf32>
    %56 = vector.broadcast %48 : vector<16x1xf32> to vector<16x32xf32>
    %57 = arith.subf %42, %56 : vector<16x32xf32>
    %cst_27 = arith.constant 9.99999974E-6 : f32
    %58 = vector.broadcast %cst_27 : f32 to vector<16x1xf32>
    %59 = arith.addf %55, %58 : vector<16x1xf32>
    %60 = math.rsqrt %59 : vector<16x1xf32>
    %61 = vector.broadcast %60 : vector<16x1xf32> to vector<16x32xf32>
    %62 = arith.mulf %57, %61 : vector<16x32xf32>
    %63 = vector.broadcast %43 : vector<1x32xf32> to vector<16x32xf32>
    %64 = arith.mulf %62, %63 : vector<16x32xf32>
    %65 = vector.broadcast %44 : vector<1x32xf32> to vector<16x32xf32>
    %66 = arith.addf %64, %65 : vector<16x32xf32>
    %c0_28 = arith.constant 0 : index
    %c0_29 = arith.constant 0 : index
    %67 = vector.load %arg7[%c0_28, %c0_29] : memref<32x8xf32, #tpu.memory_space<vmem>>, vector<32x8xf32>
    %cst_30 = arith.constant dense<0.000000e+00> : vector<16x8xf32>
    %68 = tpu.matmul %66, %67, %cst_30 {dimension_numbers = #tpu.dot_dimension_numbers<[1], [0], [0], [1], [0, 0, 1, 1], [], []>} : vector<16x32xf32>, vector<32x8xf32>, vector<16x8xf32> -> vector<16x8xf32>
    %c0_31 = arith.constant 0 : index
    %c0_32 = arith.constant 0 : index
    %69 = vector.load %arg8[%c0_31, %c0_32] : memref<1x8xf32, #tpu.memory_space<vmem>>, vector<1x8xf32>
    %70 = vector.broadcast %69 : vector<1x8xf32> to vector<16x8xf32>
    %71 = arith.addf %68, %70 : vector<16x8xf32>
    %72 = vector.shape_cast %71 : vector<16x8xf32> to vector<2x8x8xf32>
    %c0_33 = arith.constant 0 : index
    %c0_34 = arith.constant 0 : index
    %73 = vector.load %arg9[%c0_33, %c0_34] : memref<32x16xf32, #tpu.memory_space<vmem>>, vector<32x16xf32>
    %cst_35 = arith.constant dense<0.000000e+00> : vector<16x16xf32>
    %74 = tpu.matmul %7, %73, %cst_35 {dimension_numbers = #tpu.dot_dimension_numbers<[1], [0], [0], [1], [0, 0, 1, 1], [], []>} : vector<16x32xf32>, vector<32x16xf32>, vector<16x16xf32> -> vector<16x16xf32>
    %c0_36 = arith.constant 0 : index
    %c0_37 = arith.constant 0 : index
    %75 = vector.load %arg10[%c0_36, %c0_37] : memref<1x16xf32, #tpu.memory_space<vmem>>, vector<1x16xf32>
    %76 = vector.broadcast %75 : vector<1x16xf32> to vector<16x16xf32>
    %77 = arith.addf %74, %76 : vector<16x16xf32>
    %78 = vector.shape_cast %77 : vector<16x16xf32> to vector<2x8x16xf32>
    %79 = vector.extract_strided_slice %78 {offsets = [0, 0, 0], sizes = [2, 8, 8], strides = [1, 1, 1]} : vector<2x8x16xf32> to vector<2x8x8xf32>
    %80 = vector.extract_strided_slice %78 {offsets = [0, 0, 8], sizes = [2, 8, 8], strides = [1, 1, 1]} : vector<2x8x16xf32> to vector<2x8x8xf32>
    "tpu.trace_start"() <{level = 10 : i32, message = "bqd,bkd->bqk"}> : () -> ()
    %cst_38 = arith.constant dense<0.000000e+00> : vector<2x8x8xf32>
    %81 = tpu.matmul %72, %79, %cst_38 {dimension_numbers = #tpu.dot_dimension_numbers<[2], [2], [1], [1], [0, 0, 0, 1, 1, 1], [0], [0]>} : vector<2x8x8xf32>, vector<2x8x8xf32>, vector<2x8x8xf32> -> vector<2x8x8xf32>
    "tpu.trace_stop"() : () -> ()
    %cst_39 = arith.constant dense<0xFF800000> : vector<2x8xf32>
    %82 = vector.multi_reduction <maximumf>, %81, %cst_39 [2] : vector<2x8x8xf32> to vector<2x8xf32>
    %83 = vector.shape_cast %82 : vector<2x8xf32> to vector<2x8x1xf32>
    %84 = vector.broadcast %83 : vector<2x8x1xf32> to vector<2x8x8xf32>
    %85 = arith.subf %81, %84 : vector<2x8x8xf32>
    %86 = math.exp %85 : vector<2x8x8xf32>
    %cst_40 = arith.constant dense<0.000000e+00> : vector<2x8xf32>
    %87 = vector.multi_reduction <add>, %86, %cst_40 [2] : vector<2x8x8xf32> to vector<2x8xf32>
    %88 = vector.shape_cast %87 : vector<2x8xf32> to vector<2x8x1xf32>
    %89 = tpu.reciprocal %88 : vector<2x8x1xf32> -> vector<2x8x1xf32>
    %90 = vector.broadcast %89 : vector<2x8x1xf32> to vector<2x8x8xf32>
    %91 = arith.mulf %86, %90 : vector<2x8x8xf32>
    "tpu.trace_start"() <{level = 10 : i32, message = "bqk,bkd->bqd"}> : () -> ()
    %cst_41 = arith.constant dense<0.000000e+00> : vector<2x8x8xf32>
    %92 = tpu.matmul %91, %80, %cst_41 {dimension_numbers = #tpu.dot_dimension_numbers<[2], [1], [1], [2], [0, 0, 0, 1, 1, 2], [0], [0]>} : vector<2x8x8xf32>, vector<2x8x8xf32>, vector<2x8x8xf32> -> vector<2x8x8xf32>
    "tpu.trace_stop"() : () -> ()
    %93 = vector.shape_cast %92 : vector<2x8x8xf32> to vector<16x8xf32>
    %c0_42 = arith.constant 0 : index
    %c0_43 = arith.constant 0 : index
    %94 = vector.load %arg11[%c0_42, %c0_43] : memref<8x32xf32, #tpu.memory_space<vmem>>, vector<8x32xf32>
    %cst_44 = arith.constant dense<0.000000e+00> : vector<16x32xf32>
    %95 = tpu.matmul %93, %94, %cst_44 {dimension_numbers = #tpu.dot_dimension_numbers<[1], [0], [0], [1], [0, 0, 1, 1], [], []>} : vector<16x8xf32>, vector<8x32xf32>, vector<16x32xf32> -> vector<16x32xf32>
    %96 = arith.addf %95, %66 : vector<16x32xf32>
    %c1 = arith.constant 1 : index
    %c0_45 = arith.constant 0 : index
    %97 = vector.load %arg12[%c1, %c0_45] : memref<3x32xf32, #tpu.memory_space<vmem>>, vector<1x32xf32>
    %c1_46 = arith.constant 1 : index
    %c0_47 = arith.constant 0 : index
    %98 = vector.load %arg13[%c1_46, %c0_47] : memref<3x32xf32, #tpu.memory_space<vmem>>, vector<1x32xf32>
    %cst_48 = arith.constant dense<0.000000e+00> : vector<16xf32>
    %99 = vector.multi_reduction <add>, %96, %cst_48 [1] : vector<16x32xf32> to vector<16xf32>
    %100 = vector.shape_cast %99 : vector<16xf32> to vector<16x1xf32>
    %cst_49 = arith.constant 3.200000e+01 : f32
    %101 = vector.broadcast %cst_49 : f32 to vector<16x1xf32>
    %102 = arith.divf %100, %101 : vector<16x1xf32>
    %103 = vector.broadcast %102 : vector<16x1xf32> to vector<16x32xf32>
    %104 = arith.subf %96, %103 : vector<16x32xf32>
    %105 = arith.mulf %104, %104 : vector<16x32xf32>
    %cst_50 = arith.constant dense<0.000000e+00> : vector<16xf32>
    %106 = vector.multi_reduction <add>, %105, %cst_50 [1] : vector<16x32xf32> to vector<16xf32>
    %107 = vector.shape_cast %106 : vector<16xf32> to vector<16x1xf32>
    %cst_51 = arith.constant 3.200000e+01 : f32
    %108 = vector.broadcast %cst_51 : f32 to vector<16x1xf32>
    %109 = arith.divf %107, %108 : vector<16x1xf32>
    %110 = vector.broadcast %102 : vector<16x1xf32> to vector<16x32xf32>
    %111 = arith.subf %96, %110 : vector<16x32xf32>
    %cst_52 = arith.constant 9.99999974E-6 : f32
    %112 = vector.broadcast %cst_52 : f32 to vector<16x1xf32>
    %113 = arith.addf %109, %112 : vector<16x1xf32>
    %114 = math.rsqrt %113 : vector<16x1xf32>
    %115 = vector.broadcast %114 : vector<16x1xf32> to vector<16x32xf32>
    %116 = arith.mulf %111, %115 : vector<16x32xf32>
    %117 = vector.broadcast %97 : vector<1x32xf32> to vector<16x32xf32>
    %118 = arith.mulf %116, %117 : vector<16x32xf32>
    %119 = vector.broadcast %98 : vector<1x32xf32> to vector<16x32xf32>
    %120 = arith.addf %118, %119 : vector<16x32xf32>
    %c0_53 = arith.constant 0 : index
    %c0_54 = arith.constant 0 : index
    %121 = vector.load %arg14[%c0_53, %c0_54] : memref<32x64xf32, #tpu.memory_space<vmem>>, vector<32x64xf32>
    %cst_55 = arith.constant dense<0.000000e+00> : vector<16x64xf32>
    %122 = tpu.matmul %120, %121, %cst_55 {dimension_numbers = #tpu.dot_dimension_numbers<[1], [0], [0], [1], [0, 0, 1, 1], [], []>} : vector<16x32xf32>, vector<32x64xf32>, vector<16x64xf32> -> vector<16x64xf32>
    %cst_56 = arith.constant 0.000000e+00 : f32
    %123 = vector.broadcast %cst_56 : f32 to vector<16x64xf32>
    %124 = arith.maximumf %122, %123 : vector<16x64xf32>
    %c0_57 = arith.constant 0 : index
    %c0_58 = arith.constant 0 : index
    %125 = vector.load %arg15[%c0_57, %c0_58] : memref<64x32xf32, #tpu.memory_space<vmem>>, vector<64x32xf32>
    %cst_59 = arith.constant dense<0.000000e+00> : vector<16x32xf32>
    %126 = tpu.matmul %124, %125, %cst_59 {dimension_numbers = #tpu.dot_dimension_numbers<[1], [0], [0], [1], [0, 0, 1, 1], [], []>} : vector<16x64xf32>, vector<64x32xf32>, vector<16x32xf32> -> vector<16x32xf32>
    %127 = arith.addf %126, %120 : vector<16x32xf32>
    %c2 = arith.constant 2 : index
    %c0_60 = arith.constant 0 : index
    %128 = vector.load %arg12[%c2, %c0_60] : memref<3x32xf32, #tpu.memory_space<vmem>>, vector<1x32xf32>
    %c2_61 = arith.constant 2 : index
    %c0_62 = arith.constant 0 : index
    %129 = vector.load %arg13[%c2_61, %c0_62] : memref<3x32xf32, #tpu.memory_space<vmem>>, vector<1x32xf32>
    %cst_63 = arith.constant dense<0.000000e+00> : vector<16xf32>
    %130 = vector.multi_reduction <add>, %127, %cst_63 [1] : vector<16x32xf32> to vector<16xf32>
    %131 = vector.shape_cast %130 : vector<16xf32> to vector<16x1xf32>
    %cst_64 = arith.constant 3.200000e+01 : f32
    %132 = vector.broadcast %cst_64 : f32 to vector<16x1xf32>
    %133 = arith.divf %131, %132 : vector<16x1xf32>
    %134 = vector.broadcast %133 : vector<16x1xf32> to vector<16x32xf32>
    %135 = arith.subf %127, %134 : vector<16x32xf32>
    %136 = arith.mulf %135, %135 : vector<16x32xf32>
    %cst_65 = arith.constant dense<0.000000e+00> : vector<16xf32>
    %137 = vector.multi_reduction <add>, %136, %cst_65 [1] : vector<16x32xf32> to vector<16xf32>
    %138 = vector.shape_cast %137 : vector<16xf32> to vector<16x1xf32>
    %cst_66 = arith.constant 3.200000e+01 : f32
    %139 = vector.broadcast %cst_66 : f32 to vector<16x1xf32>
    %140 = arith.divf %138, %139 : vector<16x1xf32>
    %141 = vector.broadcast %133 : vector<16x1xf32> to vector<16x32xf32>
    %142 = arith.subf %127, %141 : vector<16x32xf32>
    %cst_67 = arith.constant 9.99999974E-6 : f32
    %143 = vector.broadcast %cst_67 : f32 to vector<16x1xf32>
    %144 = arith.addf %140, %143 : vector<16x1xf32>
    %145 = math.rsqrt %144 : vector<16x1xf32>
    %146 = vector.broadcast %145 : vector<16x1xf32> to vector<16x32xf32>
    %147 = arith.mulf %142, %146 : vector<16x32xf32>
    %148 = vector.broadcast %128 : vector<1x32xf32> to vector<16x32xf32>
    %149 = arith.mulf %147, %148 : vector<16x32xf32>
    %150 = vector.broadcast %129 : vector<1x32xf32> to vector<16x32xf32>
    %151 = arith.addf %149, %150 : vector<16x32xf32>
    %152 = vector.shape_cast %151 : vector<16x32xf32> to vector<2x8x32xf32>
    %c0_68 = arith.constant 0 : index
    %c0_69 = arith.constant 0 : index
    %c0_70 = arith.constant 0 : index
    %153 = vector.load %arg16[%c0_68, %c0_69, %c0_70] : memref<2x8x32xf32, #tpu.memory_space<vmem>>, vector<2x8x32xf32>
    tpu.vector_store %arg16[%c0_68, %c0_69, %c0_70], %152 {strides = array<i32>} : memref<2x8x32xf32, #tpu.memory_space<vmem>>, vector<2x8x32xf32>,
    return
  }
  func.func @transform_0(%arg0: i32) -> (i32, i32, i32) {
    %c0_i32 = arith.constant 0 : i32
    %c0_i32_0 = arith.constant 0 : i32
    %c0_i32_1 = arith.constant 0 : i32
    %c0_i32_2 = arith.constant 0 : i32
    return %c0_i32, %c0_i32_0, %c0_i32_1 : i32, i32, i32
  }
  func.func @transform_1(%arg0: i32) -> (i32, i32, i32) {
    %c0_i32 = arith.constant 0 : i32
    %c0_i32_0 = arith.constant 0 : i32
    %c0_i32_1 = arith.constant 0 : i32
    %c0_i32_2 = arith.constant 0 : i32
    return %c0_i32, %c0_i32_0, %c0_i32_1 : i32, i32, i32
  }
  func.func @transform_2(%arg0: i32) -> (i32, i32) {
    %c0_i32 = arith.constant 0 : i32
    %c0_i32_0 = arith.constant 0 : i32
    %c0_i32_1 = arith.constant 0 : i32
    return %c0_i32, %c0_i32_0 : i32, i32
  }
  func.func @transform_3(%arg0: i32) -> (i32, i32) {
    %c0_i32 = arith.constant 0 : i32
    %c0_i32_0 = arith.constant 0 : i32
    %c0_i32_1 = arith.constant 0 : i32
    return %c0_i32, %c0_i32_0 : i32, i32
  }
  func.func @transform_4(%arg0: i32) -> (i32, i32) {
    %c0_i32 = arith.constant 0 : i32
    %c0_i32_0 = arith.constant 0 : i32
    %c0_i32_1 = arith.constant 0 : i32
    return %c0_i32, %c0_i32_0 : i32, i32
  }
  func.func @transform_5(%arg0: i32) -> (i32, i32) {
    %c0_i32 = arith.constant 0 : i32
    %c0_i32_0 = arith.constant 0 : i32
    %c0_i32_1 = arith.constant 0 : i32
    return %c0_i32, %c0_i32_0 : i32, i32
  }
  func.func @transform_6(%arg0: i32) -> (i32, i32) {
    %c0_i32 = arith.constant 0 : i32
    %c0_i32_0 = arith.constant 0 : i32
    %c0_i32_1 = arith.constant 0 : i32
    return %c0_i32, %c0_i32_0 : i32, i32
  }
  func.func @transform_7(%arg0: i32) -> (i32, i32) {
    %c0_i32 = arith.constant 0 : i32
    %c0_i32_0 = arith.constant 0 : i32
    %c0_i32_1 = arith.constant 0 : i32
    return %c0_i32, %c0_i32_0 : i32, i32
  }
  func.func @transform_8(%arg0: i32) -> (i32, i32) {
    %c0_i32 = arith.constant 0 : i32
    %c0_i32_0 = arith.constant 0 : i32
    %c0_i32_1 = arith.constant 0 : i32
    return %c0_i32, %c0_i32_0 : i32, i32
  }
  func.func @transform_9(%arg0: i32) -> (i32, i32) {
    %c0_i32 = arith.constant 0 : i32
    %c0_i32_0 = arith.constant 0 : i32
    %c0_i32_1 = arith.constant 0 : i32
    return %c0_i32, %c0_i32_0 : i32, i32
  }
  func.func @transform_10(%arg0: i32) -> (i32, i32) {
    %c0_i32 = arith.constant 0 : i32
    %c0_i32_0 = arith.constant 0 : i32
    %c0_i32_1 = arith.constant 0 : i32
    return %c0_i32, %c0_i32_0 : i32, i32
  }
  func.func @transform_11(%arg0: i32) -> (i32, i32) {
    %c0_i32 = arith.constant 0 : i32
    %c0_i32_0 = arith.constant 0 : i32
    %c0_i32_1 = arith.constant 0 : i32
    return %c0_i32, %c0_i32_0 : i32, i32
  }
  func.func @transform_12(%arg0: i32) -> (i32, i32) {
    %c0_i32 = arith.constant 0 : i32
    %c0_i32_0 = arith.constant 0 : i32
    %c0_i32_1 = arith.constant 0 : i32
    return %c0_i32, %c0_i32_0 : i32, i32
  }
  func.func @transform_13(%arg0: i32) -> (i32, i32) {
    %c0_i32 = arith.constant 0 : i32
    %c0_i32_0 = arith.constant 0 : i32
    %c0_i32_1 = arith.constant 0 : i32
    return %c0_i32, %c0_i32_0 : i32, i32
  }
  func.func @transform_14(%arg0: i32) -> (i32, i32) {
    %c0_i32 = arith.constant 0 : i32
    %c0_i32_0 = arith.constant 0 : i32
    %c0_i32_1 = arith.constant 0 : i32
    return %c0_i32, %c0_i32_0 : i32, i32
  }
  func.func @transform_15(%arg0: i32) -> (i32, i32, i32) {
    %c0_i32 = arith.constant 0 : i32
    %c0_i32_0 = arith.constant 0 : i32
    %c0_i32_1 = arith.constant 0 : i32
    return %c0_i32, %arg0, %c0_i32_0 : i32, i32, i32
  }
}

</mosaic_0001>

<bundles_post_ra>
// kernel: tpu_custom_call.1
= control target key start
LH: loop header
LB: loop body
LE: loop exit
PB: predicated region body
PF: predicated region fallthrough
CT: control target
= control target key end

     0   :  { %vm69_vm0 = vcmask 261120   ;;  %s2099_s0 = inlined_call_operand.vmem [shape: f32[2,8,32], index: 0, kind: input, shape index: {}]   ;;  %s2100_s1 = inlined_call_operand.vmem [shape: f32[2,8,32], index: 1, kind: input, shape index: {}]   ;;  %s2101_s2 = inlined_call_operand.vmem [shape: f32[8,32], index: 2, kind: input, shape index: {}]   ;;  %s2102_s3 = inlined_call_operand.vmem [shape: f32[32,24], index: 3, kind: input, shape index: {}]   ;;  %s2103_s4 = inlined_call_operand.vmem [shape: f32[1,24], index: 4, kind: input, shape index: {}]   ;;  %s2104_s5 = inlined_call_operand.vmem [shape: f32[8,32], index: 5, kind: input, shape index: {}]   ;;  %s2105_s6 = inlined_call_operand.vmem [shape: f32[32,8], index: 6, kind: input, shape index: {}]   ;;  %s2106_s7 = inlined_call_operand.vmem [shape: f32[1,8], index: 7, kind: input, shape index: {}]   ;;  %s2107_s8 = inlined_call_operand.vmem [shape: f32[32,16], index: 8, kind: input, shape index: {}]   ;;  %s2108_s9 = inlined_call_operand.vmem [shape: f32[1,16], index: 9, kind: input, shape index: {}]   ;;  %s2109_s10 = inlined_call_operand.vmem [shape: f32[8,32], index: 10, kind: input, shape index: {}]   ;;  %s2110_s11 = inlined_call_operand.vmem [shape: f32[3,32], index: 11, kind: input, shape index: {}]   ;;  %s2111_s12 = inlined_call_operand.vmem [shape: f32[3,32], index: 12, kind: input, shape index: {}]   ;;  %s2112_s13 = inlined_call_operand.vmem [shape: f32[32,64], index: 13, kind: input, shape index: {}]   ;;  %s2113_s14 = inlined_call_operand.vmem [shape: f32[64,32], index: 14, kind: input, shape index: {}]   ;;  %s2114_s15 = inlined_call_operand.hbm [shape: f32[2,8,32], index: 15, kind: output, shape index: {}]  }
   0x1   :  { %v58_v0 = vld [vmem:[%s2102_s3] sm:$0xff]  ;;  %v59_v1 = vld [vmem:[%s2102_s3 + $0x8] sm:$0xff]  ;;  %v60_v2 = vld [vmem:[%s2102_s3 + $0x10] sm:$0xff] }
   0x2   :  { %v1683_v3 = vpack.c.bf16 %v59_v1, %v58_v0  ;;  %v61_v4 = vld [vmem:[%s2102_s3 + $0x18] sm:$0xff]  ;;  %v51_v5 = vld [vmem:[%s2099_s0] sm:$0xff] }
   0x3   :  { %v1687_v6 = vpack.c.bf16 %v61_v4, %v60_v2  ;;  %v53_v7 = vld [vmem:[%s2101_s2] sm:$0xff] }
   0x4   :  { %20 = vsyncpa [#allocation3], 0  ;;  %1684 = vmatprep.subr.bf16.mxu0 %v1683_v3  ;;  %v1895_v8 = vadd.f32 %v53_v7, %v51_v5  ;;  %v52_v9 = vld [vmem:[%s2099_s0 + $0x8] sm:$0xff]  ;;  %v1790_v11 = vmov 0.0   ;;  %vm1791_vm1 = vmmov 0   ;;  %s1792_s3 = smov 120   ;;  %v306_v19 = vlaneseq }
   0x5   :  { %1686 = vmatpush3.bf16.msra.mxu0 %v1683_v3  ;;  %v1902_v10 = vadd.f32 %v53_v7, %v52_v9  ;;  %1586 = vmatprep.subr.mxu1 %v1790_v11  ;;  %v1479_v12 = vld [vmem:[%s2103_s4] ss:$0 sm:$0xff]  ;;  %vm154_vm2 = vcmask 64512   ;;  %s1793_s4 = smov 112   ;;  %v613_v9 = vld [vmem:[%s2105_s6 + $0x8] sm:$0xff]  ;;  %vm1339_vm4 = vcmask 523264  }
   0x6   :  { %1688 = vmatprep.subr.bf16.mxu0 %v1687_v6  ;;  %1578 = vmatprep.mubr.msk.f32.mxu0 %vm69_vm0, %v1895_v8  ;;  %v307_v20 = vshrl.u32 %v306_v19, 7  ;;  %v309_v21 = vand.u32 127, %v306_v19  ;;  %v489_v48 = vld [vmem:[%s2104_s5] sm:$0xff]  ;;  %v57_v19 = vld [vmem:[%s2100_s1 + $0x8] sm:$0xff]  ;;  %s1794_s26 = smov [#allocation2]  }
   0x7   :  { %1588 = vmatprep.mubr.msk.f32.mxu1 %vm1791_vm1, %v1790_v11  ;;  %v704_v5 = vld [vmem:[%s2107_s8] sm:$0xff]  ;;  %s1468_s27 = sshll.u32 %s1794_s26, 4  ;;  %s1469_s27 = int_to_ptr.vmem [resolvable:$true] %s1468_s27 }
   0x8   :  { %vm310_vm3 = vcmp.le.s32.totalorder %v309_v21, %v307_v20  ;;  %s1766_s28 = scalar_lea.vmem %s1469_s27, 256  ;;  %p1771_p1 = scmp.lt.s32.totalorder %s1469_s27, %s1469_s27 }
   0x9   :  { %1690 = vmatpush3.bf16.msra.mxu0 %v1687_v6  ;;  %v705_v6 = vld [vmem:[%s2107_s8 + $0x8] sm:$0xff]  ;;  %p1767_p0 = scmp.ne.s32.totalorder %s1469_s27, %s1766_s28  ;;  %p1772_p2 = scmp.lt.s32.totalorder %s1766_s28, %s1766_s28 }
   0xa   :  { %1581 = vmatprep.subr.mxu0 %v1790_v11  ;;  %v1699_v7 = vpack.c.bf16 %v705_v6, %v704_v5  ;;  %v1122_v5 = vld [vmem:[%s2109_s10] sm:$0xff] }
   0xb   :  { %p1773_p3 = por %p1772_p2, %p1771_p1 }
   0xc   :  { %1579 = vmatmul.mubr.msk.f32.vlgmr.msra.gmra.mrb[0].mxu0 %vm69_vm0, %v1902_v10 }
   0xd   :  { %1583 = vmatprep.mubr.msk.f32.mxu0 %vm1791_vm1, %v1790_v11  ;;  %p1774_p4 = pnand %p1773_p3, %p1767_p0 }
  0xdf   :  { %v1580_v13 = vpop.f32.mrb[0].mxu0 }
  0xe0   :  { %v142_v14 = vpop.f32.mrb[1].mxu0  ;;  %v148_v16 = vadd.f32 %v1580_v13, %v1479_v12  ;;  %v707_v13 = vld [vmem:[%s2107_s8 + $0x18] sm:$0xff] }
  0xe1   :  { %v143_v15 = vadd.f32 %v1479_v12, %v142_v14 }
  0xe3   :  { %152 = vrot.lane.b32.xlu0 %v143_v15, %s1792_s3 }
  0xe7   :  { %230 = vrot.lane.b32.xlu0 %v148_v16, %s1792_s3 }
 0x155   :  { %v153_v17 = vpop.permute.xlu0 %152 }
 0x156   :  { %1582 = vmatpush3.xpose.msk.msra.mxu0 %vm154_vm2, %v153_v17  ;;  %v56_v17 = vld [vmem:[%s2100_s1] sm:$0xff] }
 0x157   :  { %1591 = vmatprep.subr.mxu0 %v1790_v11 }
 0x159   :  { %1584 = vmatmul.mubr.msk.f32.vlgmr.msra.gmra.mrb[2].mxu0 %vm154_vm2, %v143_v15  ;;  %v231_v18 = vpop.permute.xlu0 %230 }
 0x15a   :  { %1587 = vmatpush3.xpose.msk.msra.mxu1 %vm154_vm2, %v231_v18  ;;  %1593 = vmatprep.mubr.msk.f32.mxu0 %vm1791_vm1, %v1790_v11 }
 0x15b   :  { %1596 = vmatprep.subr.mxu1 %v1790_v11 }
 0x15d   :  { %1589 = vmatmul.mubr.msk.f32.vlgmr.msra.gmra.mrb[0].mxu1 %vm154_vm2, %v148_v16 }
 0x15e   :  { %1598 = vmatprep.mubr.msk.f32.mxu1 %vm1791_vm1, %v1790_v11 }
 0x22c   :  { %v225_v22 = vpop.f32.mrb[2].mxu0 }
 0x22d   :  { %v313_v23 = vsel %vm310_vm3, -1e+09, %v225_v22  ;;  %v1585_v24 = vpop.f32.mrb[3].mxu0 }
 0x22e   :  { %v315_v25 = vsel %vm154_vm2, %v313_v23, -inf }
 0x22f   :  { %316 = vmax.xlane.f32.xlu1 %v315_v25 }
 0x230   :  { %v302_v26 = vpop.f32.mrb[0].mxu1 }
 0x231   :  { %v314_v27 = vsel %vm310_vm3, -1e+09, %v302_v26  ;;  %v1590_v28 = vpop.f32.mrb[1].mxu1 }
 0x232   :  { %v318_v29 = vsel %vm154_vm2, %v314_v27, -inf }
 0x233   :  { %319 = vmax.xlane.f32.xlu1 %v318_v29  ;;  %v1491_v29 = vld [vmem:[%s2111_s12] ss:$0 sm:$0xff] }
 0x2bc   :  { %v317_v30 = vpop.xlane.xlu1 %316 }
 0x2bd   :  { %v321_v31 = vsub.f32 %v313_v23, %v317_v30 }
 0x2bf   :  { %v323_v32 = vmul.f32 1.442695, %v321_v31 }
 0x2c0   :  { %v320_v33 = vpop.xlane.xlu1 %319 }
 0x2c1   :  { %1738 = vpow2.f32 %v323_v32  ;;  %v322_v34 = vsub.f32 %v314_v27, %v320_v33  ;;  %v1490_v27 = vld [vmem:[%s2110_s11] ss:$0 sm:$0xff] }
 0x2c3   :  { %v325_v35 = vmul.f32 1.442695, %v322_v34 }
 0x2c5   :  { %1740 = vpow2.f32 %v325_v35 }
 0x2cb   :  { %v1739_v36 = vpop.eup %1738 }
 0x2cc   :  { %v327_v37 = vsel %vm154_vm2, %v1739_v36, 0.0 }
 0x2cd   :  { %328 = vadd.xlane.f32.xlu0 %v327_v37 }
 0x2cf   :  { %v1741_v38 = vpop.eup %1740 }
 0x2d0   :  { %v330_v39 = vsel %vm154_vm2, %v1741_v38, 0.0 }
 0x2d1   :  { %331 = vadd.xlane.f32.xlu1 %v330_v39 }
 0x2e2   :  { %337 = vrot.lane.b32.xlu1 %v143_v15, %s1793_s4  ;;  %v614_v15 = vld [vmem:[%s2105_s6 + $0x10] sm:$0xff] }
 0x2e6   :  { %413 = vrot.lane.b32.xlu1 %v148_v16, %s1793_s4  ;;  %v615_v16 = vld [vmem:[%s2105_s6 + $0x18] sm:$0xff] }
 0x2e7   :  { %v1695_v18 = vpack.c.bf16 %v615_v16, %v614_v15 }
 0x35a   :  { %v329_v40 = vpop.xlane.xlu0 %328 }
 0x35b   :  { %1742 = vrcp.f32 %v329_v40 }
 0x35e   :  { %v332_v41 = vpop.xlane.xlu1 %331 }
 0x35f   :  { %1744 = vrcp.f32 %v332_v41  ;;  %v1492_v41 = vld [vmem:[%s2106_s7] ss:$0 sm:$0xff] }
 0x362   :  { %v338_v42 = vpop.permute.xlu1 %337 }
 0x363   :  { %1592 = vmatpush3.msra.mxu0 %v338_v42 }
 0x364   :  { %1601 = vmatprep.subr.mxu0 %v489_v48 }
 0x365   :  { %v1743_v43 = vpop.eup %1742 }
 0x366   :  { %v335_v44 = vmul.f32 %v1743_v43, %v1739_v36  ;;  %v414_v45 = vpop.permute.xlu1 %413  ;;  %v1495_v36 = vld [vmem:[%s2108_s9] ss:$0 sm:$0xff] }
 0x367   :  { %1597 = vmatpush3.msra.mxu1 %v414_v45 }
 0x368   :  { %1594 = vmatmul.mubr.msk.f32.vlgmr.msra.gmra.mrb[4].mxu0 %vm154_vm2, %v335_v44 }
 0x369   :  { %v1745_v46 = vpop.eup %1744  ;;  %1602 = vmatpush3.msra.mxu0 %v489_v48 }
 0x36a   :  { %v336_v47 = vmul.f32 %v1745_v46, %v1741_v38  ;;  %1700 = vmatprep.subr.bf16.mxu0 %v1699_v7 }
 0x36c   :  { %1599 = vmatmul.mubr.msk.f32.vlgmr.msra.gmra.mrb[2].mxu1 %vm154_vm2, %v336_v47 }
 0x43b   :  { %v409_v49 = vpop.f32.mrb[4].mxu0 }
 0x43c   :  { %v1595_v50 = vpop.f32.mrb[5].mxu0  ;;  %1603 = vmatprep.mubr.msk.f32.mxu0 %vm154_vm2, %v409_v49 }
 0x43f   :  { %v485_v51 = vpop.f32.mrb[2].mxu1 }
 0x440   :  { %v1600_v52 = vpop.f32.mrb[3].mxu1  ;;  %1604 = vmatmul.mubr.msk.f32.vlgmr.msra.gmra.mrb[6].mxu0 %vm154_vm2, %v485_v51 }
 0x441   :  { %1702 = vmatpush3.bf16.msra.mxu0 %v1699_v7  ;;  %1625 = vmatprep.mubr.msk.f32.mxu0 %vm69_vm0, %v56_v17 }
 0x513   :  { %v1605_v53 = vpop.f32.mrb[6].mxu0 }
 0x514   :  { %v568_v54 = vadd.f32 %v1605_v53, %v1902_v10  ;;  %v562_v55 = vpop.f32.mrb[7].mxu0  ;;  %v706_v10 = vld [vmem:[%s2107_s8 + $0x10] sm:$0xff] }
 0x515   :  { %v563_v56 = vadd.f32 %v562_v55, %v1895_v8  ;;  %v612_v8 = vld [vmem:[%s2105_s6] sm:$0xff]  ;;  %v1703_v14 = vpack.c.bf16 %v707_v13, %v706_v10 }
 0x516   :  { %v576_v57 = vsel %vm69_vm0, %v568_v54, 0.0  ;;  %v1691_v12 = vpack.c.bf16 %v613_v9, %v612_v8 }
 0x517   :  { %577 = vadd.xlane.f32.xlu0 %v576_v57  ;;  %v573_v58 = vsel %vm69_vm0, %v563_v56, 0.0  ;;  %1704 = vmatprep.subr.bf16.mxu0 %v1703_v14 }
 0x518   :  { %574 = vadd.xlane.f32.xlu1 %v573_v58  ;;  %1692 = vmatprep.subr.bf16.mxu1 %v1691_v12 }
 0x519   :  { %1694 = vmatpush3.bf16.msra.mxu1 %v1691_v12  ;;  %1706 = vmatpush3.bf16.msra.mxu0 %v1703_v14 }
 0x51a   :  { %1633 = vmatprep.subr.mxu0 %v1790_v11  ;;  %1696 = vmatprep.subr.bf16.mxu1 %v1695_v18 }
 0x51c   :  { %1626 = vmatmul.mubr.msk.f32.vlgmr.msra.gmra.mrb[8].mxu0 %vm69_vm0, %v57_v19 }
 0x51d   :  { %1698 = vmatpush3.bf16.msra.mxu1 %v1695_v18  ;;  %1635 = vmatprep.mubr.msk.f32.mxu0 %vm1791_vm1, %v1790_v11 }
 0x51e   :  { %1628 = vmatprep.subr.mxu1 %v1790_v11 }
 0x5a4   :  { %v578_v59 = vpop.xlane.xlu0 %577 }
 0x5a5   :  { %v581_v60 = vmul.f32 0.03125, %v578_v59  ;;  %v575_v61 = vpop.xlane.xlu1 %574 }
 0x5a6   :  { %v580_v62 = vmul.f32 0.03125, %v575_v61 }
 0x5a7   :  { %v583_v63 = vsub.f32 %v568_v54, %v581_v60 }
 0x5a8   :  { %v582_v0 = vsub.f32 %v563_v56, %v580_v62 }
 0x5a9   :  { %v585_v3 = vmul.f32 %v583_v63, %v583_v63 }
 0x5aa   :  { %v584_v1 = vmul.f32 %v582_v0, %v582_v0 }
 0x5ab   :  { %v589_v4 = vsel %vm69_vm0, %v585_v3, 0.0 }
 0x5ac   :  { %v586_v2 = vsel %vm69_vm0, %v584_v1, 0.0 }
 0x5ad   :  { %587 = vadd.xlane.f32.xlu0 %v586_v2 }
 0x5b1   :  { %590 = vadd.xlane.f32.xlu0 %v589_v4 }
 0x5ef   :  { %v1627_v37 = vpop.f32.mrb[8].mxu0 }
 0x5f0   :  { %v793_v38 = vadd.f32 %v1627_v37, %v1495_v36  ;;  %v787_v39 = vpop.f32.mrb[9].mxu0  ;;  %v1334_v37 = vld [vmem:[%s2113_s14 + $0x18] sm:$0xff] }
 0x5f1   :  { %v788_v40 = vadd.f32 %v1495_v36, %v787_v39  ;;  %v1335_v39 = vld [vmem:[%s2113_s14 + $0x20] sm:$0xff] }
 0x5f2   :  { %1634 = vmatpush3.xpose.msk.msra.mxu0 %vm154_vm2, %v793_v38  ;;  %1046 = vrot.lane.b32.xlu1 %v793_v38, %s1792_s3 }
 0x5f3   :  { %1643 = vmatprep.subr.mxu0 %v1790_v11 }
 0x63a   :  { %v588_v20 = vpop.xlane.xlu0 %587 }
 0x63b   :  { %v592_v21 = vmul.f32 0.03125, %v588_v20 }
 0x63d   :  { %v594_v22 = vadd.f32 1e-05, %v592_v21 }
 0x63e   :  { %v591_v23 = vpop.xlane.xlu0 %590 }
 0x63f   :  { %1746 = vrsqrt.f32 %v594_v22  ;;  %v593_v24 = vmul.f32 0.03125, %v591_v23 }
 0x641   :  { %v595_v25 = vadd.f32 1e-05, %v593_v24 }
 0x643   :  { %1748 = vrsqrt.f32 %v595_v25 }
 0x649   :  { %v1747_v26 = vpop.eup %1746 }
 0x64a   :  { %v598_v28 = vmul.f32 %v1747_v26, %v582_v0 }
 0x64c   :  { %v604_v30 = vmul.f32 %v1490_v27, %v598_v28  ;;  %v1245_v28 = vld [vmem:[%s2112_s13 + $0x8] sm:$0xff] }
 0x64d   :  { %v1749_v31 = vpop.eup %1748 }
 0x64e   :  { %v599_v32 = vmul.f32 %v1749_v31, %v583_v63  ;;  %v1986_v33 = vadd.f32 %v1491_v29, %v604_v30  ;;  %v1246_v30 = vld [vmem:[%s2112_s13 + $0x10] sm:$0xff]  ;;  %v1247_v31 = vld [vmem:[%s2112_s13 + $0x18] sm:$0xff] }
 0x650   :  { %v605_v34 = vmul.f32 %v1490_v27, %v599_v32  ;;  %1614 = vmatprep.mubr.msk.f32.mxu1 %vm69_vm0, %v1986_v33  ;;  %v1244_v27 = vld [vmem:[%s2112_s13] sm:$0xff]  ;;  %v1711_v32 = vpack.c.bf16 %v1247_v31, %v1246_v30 }
 0x652   :  { %v1990_v35 = vadd.f32 %v1491_v29, %v605_v34  ;;  %v1707_v29 = vpack.c.bf16 %v1245_v28, %v1244_v27  ;;  %v1332_v34 = vld [vmem:[%s2113_s14 + $0x8] sm:$0xff]  ;;  %v1513_v28 = vld [vmem:[%s2111_s12 + $0x2] ss:$0 sm:$0xff] }
 0x654   :  { %1615 = vmatmul.mubr.msk.f32.vlgmr.msra.gmra.mrb[4].mxu1 %vm69_vm0, %v1990_v35 }
 0x655   :  { %1630 = vmatprep.mubr.msk.f32.mxu1 %vm1791_vm1, %v1790_v11  ;;  %1629 = vmatpush3.xpose.msk.msra.mxu1 %vm154_vm2, %v788_v40 }
 0x656   :  { %1638 = vmatprep.subr.mxu1 %v1790_v11 }
 0x664   :  { %v1047_v45 = vpop.permute.xlu1 %1046 }
 0x727   :  { %v1616_v42 = vpop.f32.mrb[4].mxu1 }
 0x728   :  { %v701_v43 = vadd.f32 %v1616_v42, %v1492_v41  ;;  %v695_v44 = vpop.f32.mrb[5].mxu1 }
 0x729   :  { %v696_v46 = vadd.f32 %v1492_v41, %v695_v44 }
 0x72a   :  { %1636 = vmatmul.mubr.msk.f32.vlgmr.msra.gmra.mrb[10].mxu0 %vm154_vm2, %v701_v43 }
 0x72b   :  { %1631 = vmatmul.mubr.msk.f32.vlgmr.msra.gmra.mrb[6].mxu1 %vm154_vm2, %v696_v46  ;;  %1644 = vmatpush3.msra.mxu0 %v1047_v45 }
 0x72c   :  { %1645 = vmatprep.mubr.msk.f32.mxu0 %vm1791_vm1, %v1790_v11  ;;  %1640 = vmatprep.mubr.msk.f32.mxu1 %vm1791_vm1, %v1790_v11 }
 0x72d   :  { %1708 = vmatprep.subr.bf16.mxu0 %v1707_v29 }
 0x7fd   :  { %v944_v47 = vpop.f32.mrb[10].mxu0 }
 0x7fe   :  { %v868_v48 = vpop.f32.mrb[6].mxu1  ;;  %v1637_v49 = vpop.f32.mrb[11].mxu0  ;;  %v951_v52 = vsel %vm154_vm2, %v944_v47, -inf }
 0x7ff   :  { %v1632_v50 = vpop.f32.mrb[7].mxu1  ;;  %v948_v51 = vsel %vm154_vm2, %v868_v48, -inf  ;;  %v1506_v49 = vld [vmem:[%s2110_s11 + $0x1] ss:$0 sm:$0xff] }
 0x800   :  { %949 = vmax.xlane.f32.xlu0 %v948_v51 }
 0x804   :  { %952 = vmax.xlane.f32.xlu0 %v951_v52 }
 0x88d   :  { %v950_v53 = vpop.xlane.xlu0 %949 }
 0x88e   :  { %v954_v54 = vsub.f32 %v868_v48, %v950_v53  ;;  %v1507_v53 = vld [vmem:[%s2111_s12 + $0x1] ss:$0 sm:$0xff] }
 0x890   :  { %v956_v57 = vmul.f32 1.442695, %v954_v54 }
 0x891   :  { %v953_v55 = vpop.xlane.xlu0 %952 }
 0x892   :  { %v955_v56 = vsub.f32 %v944_v47, %v953_v55 }
 0x894   :  { %v958_v58 = vmul.f32 1.442695, %v955_v56 }
 0x896   :  { %1750 = vpow2.f32 %v958_v58  ;;  %v1337_v58 = vld [vmem:[%s2113_s14 + $0x30] sm:$0xff] }
 0x897   :  { %1752 = vpow2.f32 %v956_v57 }
 0x8a0   :  { %v1751_v59 = vpop.eup %1750 }
 0x8a1   :  { %v963_v11 = vsel %vm154_vm2, %v1751_v59, 0.0  ;;  %v1753_v60 = vpop.eup %1752 }
 0x8a2   :  { %964 = vadd.xlane.f32.xlu0 %v963_v11  ;;  %v960_v61 = vsel %vm154_vm2, %v1753_v60, 0.0 }
 0x8a6   :  { %961 = vadd.xlane.f32.xlu0 %v960_v61 }
 0x8bc   :  { %970 = vrot.lane.b32.xlu0 %v788_v40, %s1792_s3  ;;  %v1336_v40 = vld [vmem:[%s2113_s14 + $0x28] sm:$0xff] }
 0x8bd   :  { %v1723_v41 = vpack.c.bf16 %v1336_v40, %v1335_v39 }
 0x92f   :  { %v965_v62 = vpop.xlane.xlu0 %964 }
 0x930   :  { %1754 = vrcp.f32 %v965_v62 }
 0x933   :  { %v962_v63 = vpop.xlane.xlu0 %961 }
 0x934   :  { %1756 = vrcp.f32 %v962_v63 }
 0x937   :  { %v971_v0 = vpop.permute.xlu0 %970 }
 0x938   :  { %1639 = vmatpush3.msra.mxu1 %v971_v0 }
 0x939   :  { %1648 = vmatprep.subr.mxu1 %v1122_v5 }
 0x93a   :  { %v1755_v1 = vpop.eup %1754 }
 0x93b   :  { %v969_v2 = vmul.f32 %v1755_v1, %v1751_v59  ;;  %v1338_v59 = vld [vmem:[%s2113_s14 + $0x38] sm:$0xff] }
 0x93c   :  { %v1727_v11 = vpack.c.bf16 %v1338_v59, %v1337_v58 }
 0x93d   :  { %1646 = vmatmul.mubr.msk.f32.vlgmr.msra.gmra.mrb[12].mxu0 %vm154_vm2, %v969_v2 }
 0x93e   :  { %v1757_v3 = vpop.eup %1756  ;;  %1710 = vmatpush3.bf16.msra.mxu0 %v1707_v29 }
 0x93f   :  { %v968_v4 = vmul.f32 %v1757_v3, %v1753_v60  ;;  %1712 = vmatprep.subr.bf16.mxu0 %v1711_v32 }
 0x941   :  { %1641 = vmatmul.mubr.msk.f32.vlgmr.msra.gmra.mrb[8].mxu1 %vm154_vm2, %v968_v4 }
 0x942   :  { %1649 = vmatpush3.msra.mxu1 %v1122_v5  ;;  %1714 = vmatpush3.bf16.msra.mxu0 %v1711_v32 }
 0xa10   :  { %v1118_v6 = vpop.f32.mrb[12].mxu0 }
 0xa11   :  { %v1647_v7 = vpop.f32.mrb[13].mxu0 }
 0xa14   :  { %v1042_v8 = vpop.f32.mrb[8].mxu1 }
 0xa15   :  { %v1642_v9 = vpop.f32.mrb[9].mxu1  ;;  %1650 = vmatprep.mubr.msk.f32.mxu1 %vm154_vm2, %v1042_v8 }
 0xa16   :  { %1651 = vmatmul.mubr.msk.f32.vlgmr.msra.gmra.mrb[10].mxu1 %vm154_vm2, %v1118_v6 }
 0xae9   :  { %v1652_v10 = vpop.f32.mrb[10].mxu1 }
 0xaea   :  { %v1201_v12 = vadd.f32 %v1652_v10, %v1990_v35  ;;  %v1195_v13 = vpop.f32.mrb[11].mxu1  ;;  %v1333_v35 = vld [vmem:[%s2113_s14 + $0x10] sm:$0xff] }
 0xaeb   :  { %v1196_v14 = vadd.f32 %v1195_v13, %v1986_v33  ;;  %v1331_v33 = vld [vmem:[%s2113_s14] sm:$0xff]  ;;  %v1719_v38 = vpack.c.bf16 %v1334_v37, %v1333_v35 }
 0xaec   :  { %v1209_v15 = vsel %vm69_vm0, %v1201_v12, 0.0  ;;  %v1715_v36 = vpack.c.bf16 %v1332_v34, %v1331_v33 }
 0xaed   :  { %1210 = vadd.xlane.f32.xlu0 %v1209_v15  ;;  %v1206_v16 = vsel %vm69_vm0, %v1196_v14, 0.0 }
 0xaee   :  { %1207 = vadd.xlane.f32.xlu1 %v1206_v16  ;;  %1716 = vmatprep.subr.bf16.mxu1 %v1715_v36 }
 0xaef   :  { %1718 = vmatpush3.bf16.msra.mxu1 %v1715_v36 }
 0xaf0   :  { %1720 = vmatprep.subr.bf16.mxu1 %v1719_v38 }
 0xaf3   :  { %1722 = vmatpush3.bf16.msra.mxu1 %v1719_v38 }
 0xaf4   :  { %1724 = vmatprep.subr.bf16.mxu1 %v1723_v41 }
 0xaf7   :  { %1726 = vmatpush3.bf16.msra.mxu1 %v1723_v41 }
 0xaf8   :  { %1728 = vmatprep.subr.bf16.mxu1 %v1727_v11 }
 0xafb   :  { %1730 = vmatpush3.bf16.msra.mxu1 %v1727_v11 }
 0xb7a   :  { %v1211_v17 = vpop.xlane.xlu0 %1210 }
 0xb7b   :  { %v1213_v18 = vmul.f32 0.03125, %v1211_v17  ;;  %v1208_v19 = vpop.xlane.xlu1 %1207 }
 0xb7c   :  { %v1212_v20 = vmul.f32 0.03125, %v1208_v19 }
 0xb7d   :  { %v1215_v21 = vsub.f32 %v1201_v12, %v1213_v18 }
 0xb7e   :  { %v1214_v22 = vsub.f32 %v1196_v14, %v1212_v20 }
 0xb7f   :  { %v1217_v23 = vmul.f32 %v1215_v21, %v1215_v21 }
 0xb80   :  { %v1216_v24 = vmul.f32 %v1214_v22, %v1214_v22 }
 0xb81   :  { %v1221_v25 = vsel %vm69_vm0, %v1217_v23, 0.0 }
 0xb82   :  { %1222 = vadd.xlane.f32.xlu1 %v1221_v25  ;;  %v1218_v26 = vsel %vm69_vm0, %v1216_v24, 0.0  ;;  %v1512_v24 = vld [vmem:[%s2110_s11 + $0x2] ss:$0 sm:$0xff] }
 0xb83   :  { %1219 = vadd.xlane.f32.xlu0 %v1218_v26 }
 0xc0f   :  { %v1223_v42 = vpop.xlane.xlu1 %1222 }
 0xc10   :  { %v1225_v43 = vmul.f32 0.03125, %v1223_v42  ;;  %v1220_v44 = vpop.xlane.xlu0 %1219 }
 0xc11   :  { %v1224_v45 = vmul.f32 0.03125, %v1220_v44 }
 0xc12   :  { %v1227_v46 = vadd.f32 1e-05, %v1225_v43 }
 0xc13   :  { %v1226_v47 = vadd.f32 1e-05, %v1224_v45 }
 0xc14   :  { %1758 = vrsqrt.f32 %v1227_v46 }
 0xc15   :  { %1760 = vrsqrt.f32 %v1226_v47 }
 0xc1e   :  { %v1759_v48 = vpop.eup %1758 }
 0xc1f   :  { %v1761_v50 = vpop.eup %1760  ;;  %v1231_v51 = vmul.f32 %v1759_v48, %v1215_v21 }
 0xc20   :  { %v1230_v52 = vmul.f32 %v1761_v50, %v1214_v22 }
 0xc21   :  { %v1237_v54 = vmul.f32 %v1506_v49, %v1231_v51 }
 0xc22   :  { %v1236_v55 = vmul.f32 %v1506_v49, %v1230_v52 }
 0xc23   :  { %v1243_v57 = vadd.f32 %v1507_v53, %v1237_v54 }
 0xc24   :  { %v1242_v56 = vadd.f32 %v1507_v53, %v1236_v55 }
 0xc26   :  { %1661 = vmatprep.mubr.msk.f32.mxu0 %vm69_vm0, %v1242_v56 }
 0xc27   :  { %1662 = vmatmul.mubr.msk.f32.vlgmr.msra.gmra.mrb[14].mxu0 %vm69_vm0, %v1243_v57 }
 0xcfa   :  { %v1663_v60 = vpop.f32.mrb[14].mxu0 }
 0xcfb   :  { %v1320_v61 = vpop.f32.mrb[15].mxu0  ;;  %v1330_v63 = vmax.f32 %v1663_v60, 0.0 }
 0xcfc   :  { %v1329_v62 = vmax.f32 %v1320_v61, 0.0 }
 0xcfe   :  { %1680 = vmatprep.mubr.msk.f32.mxu1 %vm1339_vm4, %v1329_v62 }
 0xcff   :  { %1681 = vmatmul.mubr.msk.f32.vlgmr.msra.gmra.mrb[12].mxu1 %vm1339_vm4, %v1330_v63 }
 0xdd2   :  { %v1682_v0 = vpop.f32.mrb[12].mxu1 }
 0xdd3   :  { %v1418_v1 = vadd.f32 %v1682_v0, %v1243_v57  ;;  %v1412_v2 = vpop.f32.mrb[13].mxu1 }
 0xdd4   :  { %v1413_v3 = vadd.f32 %v1412_v2, %v1242_v56 }
 0xdd5   :  { %v1426_v4 = vsel %vm69_vm0, %v1418_v1, 0.0 }
 0xdd6   :  { %1427 = vadd.xlane.f32.xlu1 %v1426_v4  ;;  %v1423_v5 = vsel %vm69_vm0, %v1413_v3, 0.0 }
 0xdd7   :  { %1424 = vadd.xlane.f32.xlu0 %v1423_v5 }
 0xe63   :  { %v1428_v6 = vpop.xlane.xlu1 %1427 }
 0xe64   :  { %v1430_v7 = vmul.f32 0.03125, %v1428_v6  ;;  %v1425_v8 = vpop.xlane.xlu0 %1424 }
 0xe65   :  { %v1429_v9 = vmul.f32 0.03125, %v1425_v8 }
 0xe66   :  { %v1432_v10 = vsub.f32 %v1418_v1, %v1430_v7 }
 0xe67   :  { %v1431_v12 = vsub.f32 %v1413_v3, %v1429_v9 }
 0xe68   :  { %v1434_v13 = vmul.f32 %v1432_v10, %v1432_v10 }
 0xe69   :  { %v1433_v14 = vmul.f32 %v1431_v12, %v1431_v12 }
 0xe6a   :  { %v1438_v15 = vsel %vm69_vm0, %v1434_v13, 0.0 }
 0xe6b   :  { %1439 = vadd.xlane.f32.xlu1 %v1438_v15  ;;  %v1435_v16 = vsel %vm69_vm0, %v1433_v14, 0.0 }
 0xe6c   :  { %1436 = vadd.xlane.f32.xlu0 %v1435_v16 }
 0xef8   :  { %v1440_v17 = vpop.xlane.xlu1 %1439 }
 0xef9   :  { %v1442_v18 = vmul.f32 0.03125, %v1440_v17  ;;  %v1437_v19 = vpop.xlane.xlu0 %1436 }
 0xefa   :  { %v1441_v20 = vmul.f32 0.03125, %v1437_v19 }
 0xefb   :  { %v1444_v21 = vadd.f32 1e-05, %v1442_v18 }
 0xefc   :  { %v1443_v22 = vadd.f32 1e-05, %v1441_v20 }
 0xefd   :  { %1762 = vrsqrt.f32 %v1444_v21 }
 0xefe   :  { %1764 = vrsqrt.f32 %v1443_v22 }
 0xf07   :  { %v1763_v23 = vpop.eup %1762 }
 0xf08   :  { %v1765_v25 = vpop.eup %1764  ;;  %v1448_v26 = vmul.f32 %v1763_v23, %v1432_v10 }
 0xf09   :  { %v1447_v27 = vmul.f32 %v1765_v25, %v1431_v12 }
 0xf0a   :  { %v1454_v29 = vmul.f32 %v1512_v24, %v1448_v26 }
 0xf0b   :  { %v1453_v30 = vmul.f32 %v1512_v24, %v1447_v27 }
 0xf0c   :  { %v1460_v31 = vadd.f32 %v1513_v28, %v1454_v29 }
 0xf0d   :  { %v1459_v32 = vadd.f32 %v1513_v28, %v1453_v30 }
 0xf0e   :  { %1462 = vst.msk [vmem:[#allocation2 + $0x8] sm:$0xff] %vm69_vm0, %v1460_v31 }
 0xf0f   :  { %1461 = vst.msk [vmem:[#allocation2] sm:$0xff] %vm69_vm0, %v1459_v32 }
 0xf10   :  { %1777 = shalt.err (!%p1774_p4)
}
 0xf11   :  { %s1778_s29 = scalar_lea.hbm %s2114_s15, 256 }
 0xf12   :  { %p1779_p5 = scmp.ne.s32.totalorder %s2114_s15, %s1778_s29  ;;  %p1782_p6 = scmp.lt.u32.totalorder %s1778_s29, %s2114_s15 }
 0xf14   :  { %p1784_p7 = pnand %p1782_p6, %p1779_p5 }
 0xf16   :  { %1787 = shalt.err (!%p1784_p7)
}
 0xf17   :  { %s1795_s4 = smov 128   ;;  %s1796_s17 = smov 8  }
 0xf18   :  { %1474 = dma.vmem_to_hbm [thread:$0]  %s1469_s27, 256, %s2114_s15, [#allocation3], %s1795_s4, %s1795_s4, %s1796_s17  }
 0xf19   :  { %1788 = dma.done.wait [#allocation3], 256  }
 0xf1a   :  { %1789 = vsyncadd [#allocation3], 4294967040 }
 0xf1b   :  { %1478 = vsyncpa [#allocation3], 1 }

</bundles_post_ra>
